<compile_context>
chip_gen: v6e
topology: v6e:2x2x1
jax: 0.10.0
libtpu: 0.0.40
codegen_flags: <defaults>
</compile_context>

<pallas_src>
import jax
import jax.numpy as jnp
from jax import lax
from jax.experimental import pallas as pl
from jax.experimental.pallas import tpu as pltpu


def _gelu_exact(x):
    # PyTorch nn.GELU() default = exact erf formulation.
    return 0.5 * x * (1.0 + lax.erf(x * 0.7071067811865476))


def cross_transformer_kernel(
    f1_ref,                       # (nb, N, C)  f32   fmap1 rows (queries + residual)
    f2_ref,                       # (nb, kvt, C) f32  fmap2 kv chunk
    wq_ref, bq_ref,               # (C, C) bf16, (1, C) f32   (1/sqrt(C) folded in)
    wk_ref, bk_ref,               # (C, C) bf16, (1, C) f32
    wv_ref, bv_ref,               # (C, C) bf16, (1, C) f32
    wp_ref, bp_ref,               # (C, C) bf16, (1, C) f32
    w1_ref, b1_ref,               # (C, Ch) bf16, (1, Ch) f32
    w2_ref, b2_ref,               # (Ch, C) bf16, (1, C) f32
    o_ref,                        # (nb, N, C) f32
    q_sc,                         # (nb, N, C) bf16 scratch : scaled q projection
    m_sc,                         # (nb, N, 1) f32 scratch  : running row max
    l_sc,                         # (nb, N, 1) f32 scratch  : running row sum
    acc_sc,                       # (nb, N, C) f32 scratch  : unnormalized context
):
    nb, n, c = f1_ref.shape
    kvt = f2_ref.shape[1]
    kv = pl.program_id(1)

    # ---- once per batch step: q projection + accumulator init ---------------
    @pl.when(kv == 0)
    def _():
        x1 = f1_ref[...].reshape(nb * n, c).astype(jnp.bfloat16)
        q = jnp.dot(x1, wq_ref[...],
                    preferred_element_type=jnp.float32) + bq_ref[...]
        q_sc[...] = q.reshape(nb, n, c).astype(jnp.bfloat16)
        m_sc[...] = jnp.full_like(m_sc, -jnp.inf)
        l_sc[...] = jnp.zeros_like(l_sc)
        acc_sc[...] = jnp.zeros_like(acc_sc)

    # ---- per kv chunk: k/v projection (separate matmuls, lane-0 outputs) ----
    x2 = f2_ref[...].reshape(nb * kvt, c).astype(jnp.bfloat16)
    k = jnp.dot(x2, wk_ref[...],
                preferred_element_type=jnp.float32) + bk_ref[...]
    v = jnp.dot(x2, wv_ref[...],
                preferred_element_type=jnp.float32) + bv_ref[...]
    k = k.reshape(nb, kvt, c).astype(jnp.bfloat16)
    v = v.reshape(nb, kvt, c).astype(jnp.bfloat16)

    # ---- online softmax update (flash) ---------------------------------------
    s = jnp.einsum("bnc,bmc->bnm", q_sc[...], k,
                   preferred_element_type=jnp.float32)        # (nb, N, kvt)
    m_prev = m_sc[...]
    m_new = jnp.maximum(m_prev, jnp.max(s, axis=-1, keepdims=True))
    alpha = jnp.exp(m_prev - m_new)
    p = jnp.exp(s - m_new)
    l_sc[...] = alpha * l_sc[...] + jnp.sum(p, axis=-1, keepdims=True)
    acc_sc[...] = alpha * acc_sc[...] + jnp.einsum(
        "bnm,bmc->bnc", p.astype(jnp.bfloat16), v,
        preferred_element_type=jnp.float32)
    m_sc[...] = m_new

    # ---- once per batch step: normalize, project, residuals, MLP -------------
    @pl.when(kv == pl.num_programs(1) - 1)
    def _():
        # Post-normalization: one O(N*C) scale instead of scaling the prob matrix.
        ctx = acc_sc[...] * pl.reciprocal(l_sc[...], approx=True)
        proj = jnp.dot(ctx.reshape(nb * n, c).astype(jnp.bfloat16), wp_ref[...],
                       preferred_element_type=jnp.float32) + bp_ref[...]
        a = f1_ref[...] + proj.reshape(nb, n, c)              # f32 residual (Identity norm)

        h = jnp.dot(a.reshape(nb * n, c).astype(jnp.bfloat16), w1_ref[...],
                    preferred_element_type=jnp.float32) + b1_ref[...]
        h = _gelu_exact(h)
        mlp = jnp.dot(h.astype(jnp.bfloat16), w2_ref[...],
                      preferred_element_type=jnp.float32) + b2_ref[...]

        o_ref[...] = a + mlp.reshape(nb, n, c)


def cross_transformer_block(fmap1, fmap2, params, *, batch_tile=None, kv_tile=None):
    """fmap1, fmap2: (B, H, W, C) float32.  Returns (B, H, W, C) float32."""
    B, H, W, C = fmap1.shape
    N = H * W
    Ch = params["w1"].shape[1]

    # --- batch tiling: >=2 steps (when B allows) so v7x's two TensorCores both
    #     get work via the "parallel" axis, and input/output DMA pipelines. ----
    if batch_tile is None:
        target_steps = min(B, 4)
        nb = max(1, B // target_steps)
        while B % nb:
            nb -= 1
    else:
        nb = batch_tile
    assert B % nb == 0, "batch_tile must divide B"

    # --- kv tiling: bound the per-step score slab to (N, kv_tile). ------------
    if kv_tile is None:
        kvt = min(N, 512)
    else:
        kvt = kv_tile
    while N % kvt:
        kvt -= 1
    assert kvt == N or kvt % 8 == 0, "kv_tile must be N or a multiple of 8"

    x1 = fmap1.reshape(B, N, C)
    x2 = fmap2.reshape(B, N, C)

    scale = C ** (-0.5)
    # Fold the attention scale into the q weight/bias (reference applies the
    # scale after the bias, so scaling both is exact).  Weights ship as bf16.
    wq = (params["wq"] * scale).astype(jnp.bfloat16)
    bq = params["bq"] * scale
    wk = params["wk"].astype(jnp.bfloat16)
    wv = params["wv"].astype(jnp.bfloat16)
    wp = params["wp"].astype(jnp.bfloat16)
    w1 = params["w1"].astype(jnp.bfloat16)
    w2 = params["w2"].astype(jnp.bfloat16)
    bk, bv, bp, b1, b2 = (params["bk"], params["bv"], params["bp"],
                          params["b1"], params["b2"])

    def invariant_spec(shape):
        nd = len(shape)
        return pl.BlockSpec(shape, lambda b, kv, _nd=nd: (0,) * _nd)

    in_specs = [
        pl.BlockSpec((nb, N, C), lambda b, kv: (b, 0, 0)),    # fmap1 rows
        pl.BlockSpec((nb, kvt, C), lambda b, kv: (b, kv, 0)), # fmap2 kv chunk
        invariant_spec((C, C)), invariant_spec((1, C)),       # wq, bq
        invariant_spec((C, C)), invariant_spec((1, C)),       # wk, bk
        invariant_spec((C, C)), invariant_spec((1, C)),       # wv, bv
        invariant_spec((C, C)), invariant_spec((1, C)),       # wp, bp
        invariant_spec((C, Ch)), invariant_spec((1, Ch)),     # w1, b1
        invariant_spec((Ch, C)), invariant_spec((1, C)),      # w2, b2
    ]
    out_spec = pl.BlockSpec((nb, N, C), lambda b, kv: (b, 0, 0))

    flops = 2 * B * N * (4 * C * C + 2 * N * C + 2 * C * Ch)
    transcendentals = B * N * (N + Ch)
    bytes_accessed = (3 * B * N * C * 4
                      + 2 * (wq.size + wk.size + wv.size + wp.size + w1.size + w2.size)
                      + 4 * (bq.size + bk.size + bv.size + bp.size + b1.size + b2.size))

    out = pl.pallas_call(
        cross_transformer_kernel,
        out_shape=jax.ShapeDtypeStruct((B, N, C), jnp.float32),
        grid_spec=pltpu.PrefetchScalarGridSpec(
            num_scalar_prefetch=0,
            grid=(B // nb, N // kvt),
            in_specs=in_specs,
            out_specs=out_spec,
            scratch_shapes=[
                pltpu.VMEM((nb, N, C), jnp.bfloat16),   # q (scaled)
                pltpu.VMEM((nb, N, 1), jnp.float32),    # running max
                pltpu.VMEM((nb, N, 1), jnp.float32),    # running sum
                pltpu.VMEM((nb, N, C), jnp.float32),    # unnormalized context
            ]),
        compiler_params=pltpu.CompilerParams(
            dimension_semantics=("parallel", "arbitrary"),
            # v5e's default scoped VMEM is only 16 MiB; raise explicitly.
            vmem_limit_bytes=64 * 1024 * 1024),
        cost_estimate=pl.CostEstimate(
            flops=flops, transcendentals=transcendentals,
            bytes_accessed=bytes_accessed),
    )(x1, x2, wq, bq, wk, bk, wv, bv, wp, bp, w1, b1, w2, b2)

    return out.reshape(B, H, W, C)


def make_params(key, dim, mlp_scale):
    """Deterministic synthetic weights.  Shapes mirror nn.Linear stored as (in, out)."""
    hidden = dim * mlp_scale
    keys = jax.random.split(key, 12)

    def w(k, shape):
        return jax.random.normal(k, shape, dtype=jnp.float32) * 0.05

    return {
        "wq": w(keys[0], (dim, dim)),     "bq": w(keys[1], (1, dim)),
        "wk": w(keys[2], (dim, dim)),     "bk": w(keys[3], (1, dim)),
        "wv": w(keys[4], (dim, dim)),     "bv": w(keys[5], (1, dim)),
        "wp": w(keys[6], (dim, dim)),     "bp": w(keys[7], (1, dim)),
        "w1": w(keys[8], (dim, hidden)),  "b1": w(keys[9], (1, hidden)),
        "w2": w(keys[10], (hidden, dim)), "b2": w(keys[11], (1, dim)),
    }


def reference_forward(fmap1, fmap2, params):
    """Pure-JAX f32 reference matching the PyTorch forward (norm=None, mask=None)."""
    B, H, W, C = fmap1.shape
    N = H * W
    x1 = fmap1.reshape(B, N, C)
    x2 = fmap2.reshape(B, N, C)
    q = x1 @ params["wq"] + params["bq"]
    k = x2 @ params["wk"] + params["bk"]
    v = x2 @ params["wv"] + params["bv"]
    q = q * (C ** (-0.5))
    attn = jax.nn.softmax(jnp.einsum("bnc,bmc->bnm", q, k), axis=-1)
    x = jnp.einsum("bnm,bmc->bnc", attn, v)
    x = x @ params["wp"] + params["bp"]
    attn_fmap = x1 + x
    h = jax.nn.gelu(attn_fmap @ params["w1"] + params["b1"], approximate=False)
    out = attn_fmap + h @ params["w2"] + params["b2"]
    return out.reshape(B, H, W, C)


if __name__ == "__main__":
    B, H, W, C = 2, 8, 8, 32
    mlp_scale = 2

    key = jax.random.PRNGKey(0)
    k1, k2, kp = jax.random.split(key, 3)
    fmap1 = jax.random.normal(k1, (B, H, W, C), dtype=jnp.float32)
    fmap2 = jax.random.normal(k2, (B, H, W, C), dtype=jnp.float32)
    params = make_params(kp, C, mlp_scale)

    ref = reference_forward(fmap1, fmap2, params)

    # Exercise the multi-step flash path (2 batch steps x 2 kv steps).
    out = cross_transformer_block(fmap1, fmap2, params, batch_tile=1, kv_tile=32)
    out = jax.block_until_ready(out)
    assert out.shape == (B, H, W, C)
    assert jnp.allclose(out, ref, atol=2e-2, rtol=2e-2), "mismatch (tiled path)"

    # Default tiling path (auto batch_tile, single kv step at this small N).
    out_d = cross_transformer_block(fmap1, fmap2, params)
    out_d = jax.block_until_ready(out_d)
    assert jnp.allclose(out_d, ref, atol=2e-2, rtol=2e-2), "mismatch (default path)"

    print("KERNEL_OK")
</pallas_src>

<mosaic_0001>
module attributes {stable_mosaic.version = 11 : i64} {
  func.func @cross_transformer_kernel(%arg0: i32, %arg1: i32, %arg2: memref<1x64x32xf32, #tpu.memory_space<vmem>>, %arg3: memref<1x32x32xf32, #tpu.memory_space<vmem>>, %arg4: memref<32x32xbf16, #tpu.memory_space<vmem>>, %arg5: memref<1x32xf32, #tpu.memory_space<vmem>>, %arg6: memref<32x32xbf16, #tpu.memory_space<vmem>>, %arg7: memref<1x32xf32, #tpu.memory_space<vmem>>, %arg8: memref<32x32xbf16, #tpu.memory_space<vmem>>, %arg9: memref<1x32xf32, #tpu.memory_space<vmem>>, %arg10: memref<32x32xbf16, #tpu.memory_space<vmem>>, %arg11: memref<1x32xf32, #tpu.memory_space<vmem>>, %arg12: memref<32x64xbf16, #tpu.memory_space<vmem>>, %arg13: memref<1x64xf32, #tpu.memory_space<vmem>>, %arg14: memref<64x32xbf16, #tpu.memory_space<vmem>>, %arg15: memref<1x32xf32, #tpu.memory_space<vmem>>, %arg16: memref<1x64x32xf32, #tpu.memory_space<vmem>>, %arg17: memref<1x64x32xbf16, #tpu.memory_space<vmem>>, %arg18: memref<1x64x1xf32, #tpu.memory_space<vmem>>, %arg19: memref<1x64x1xf32, #tpu.memory_space<vmem>>, %arg20: memref<1x64x32xf32, #tpu.memory_space<vmem>>) attributes {dimension_semantics = [#tpu.dimension_semantics<parallel>, #tpu.dimension_semantics<arbitrary>], iteration_bounds = array<i64: 2, 2>, scalar_prefetch = 0 : i64, scratch_operands = 4 : i64, tpu.core_type = #tpu.core_type<tc>, window_params = [{transform_indices = @transform_0, window_bounds = array<i64: 1, 64, 32>}, {transform_indices = @transform_1, window_bounds = array<i64: 1, 32, 32>}, {pipeline_mode = #tpu.pipeline_mode<synchronous>, transform_indices = @transform_2, window_bounds = array<i64: 32, 32>}, {pipeline_mode = #tpu.pipeline_mode<synchronous>, transform_indices = @transform_3, window_bounds = array<i64: 1, 32>}, {pipeline_mode = #tpu.pipeline_mode<synchronous>, transform_indices = @transform_4, window_bounds = array<i64: 32, 32>}, {pipeline_mode = #tpu.pipeline_mode<synchronous>, transform_indices = @transform_5, window_bounds = array<i64: 1, 32>}, {pipeline_mode = #tpu.pipeline_mode<synchronous>, transform_indices = @transform_6, window_bounds = array<i64: 32, 32>}, {pipeline_mode = #tpu.pipeline_mode<synchronous>, transform_indices = @transform_7, window_bounds = array<i64: 1, 32>}, {pipeline_mode = #tpu.pipeline_mode<synchronous>, transform_indices = @transform_8, window_bounds = array<i64: 32, 32>}, {pipeline_mode = #tpu.pipeline_mode<synchronous>, transform_indices = @transform_9, window_bounds = array<i64: 1, 32>}, {pipeline_mode = #tpu.pipeline_mode<synchronous>, transform_indices = @transform_10, window_bounds = array<i64: 32, 64>}, {pipeline_mode = #tpu.pipeline_mode<synchronous>, transform_indices = @transform_11, window_bounds = array<i64: 1, 64>}, {pipeline_mode = #tpu.pipeline_mode<synchronous>, transform_indices = @transform_12, window_bounds = array<i64: 64, 32>}, {pipeline_mode = #tpu.pipeline_mode<synchronous>, transform_indices = @transform_13, window_bounds = array<i64: 1, 32>}, {transform_indices = @transform_14, window_bounds = array<i64: 1, 64, 32>}]} {
    %c0_i32 = arith.constant 0 : i32
    %0 = arith.cmpi eq, %arg1, %c0_i32 : i32
    %1 = arith.extui %0 : i1 to i32
    %c0_i32_0 = arith.constant 0 : i32
    %2 = arith.cmpi ne, %1, %c0_i32_0 : i32
    scf.if %2 {
      %c0_38 = arith.constant 0 : index
      %c0_39 = arith.constant 0 : index
      %c0_40 = arith.constant 0 : index
      %48 = vector.load %arg2[%c0_38, %c0_39, %c0_40] : memref<1x64x32xf32, #tpu.memory_space<vmem>>, vector<1x64x32xf32>
      %49 = vector.shape_cast %48 : vector<1x64x32xf32> to vector<64x32xf32>
      %50 = arith.truncf %49 : vector<64x32xf32> to vector<64x32xbf16>
      %c0_41 = arith.constant 0 : index
      %c0_42 = arith.constant 0 : index
      %51 = vector.load %arg4[%c0_41, %c0_42] : memref<32x32xbf16, #tpu.memory_space<vmem>>, vector<32x32xbf16>
      %cst_43 = arith.constant dense<0.000000e+00> : vector<64x32xf32>
      %52 = tpu.matmul %50, %51, %cst_43 {dimension_numbers = #tpu.dot_dimension_numbers<[1], [0], [0], [1], [0, 0, 1, 1], [], []>} : vector<64x32xbf16>, vector<32x32xbf16>, vector<64x32xf32> -> vector<64x32xf32>
      %c0_44 = arith.constant 0 : index
      %c0_45 = arith.constant 0 : index
      %53 = vector.load %arg5[%c0_44, %c0_45] : memref<1x32xf32, #tpu.memory_space<vmem>>, vector<1x32xf32>
      %54 = vector.broadcast %53 : vector<1x32xf32> to vector<64x32xf32>
      %55 = arith.addf %52, %54 : vector<64x32xf32>
      %56 = vector.shape_cast %55 : vector<64x32xf32> to vector<1x64x32xf32>
      %57 = arith.truncf %56 : vector<1x64x32xf32> to vector<1x64x32xbf16>
      %c0_46 = arith.constant 0 : index
      %c0_47 = arith.constant 0 : index
      %c0_48 = arith.constant 0 : index
      %58 = vector.load %arg17[%c0_46, %c0_47, %c0_48] : memref<1x64x32xbf16, #tpu.memory_space<vmem>>, vector<1x64x32xbf16>
      tpu.vector_store %arg17[%c0_46, %c0_47, %c0_48], %57 {strides = array<i32>} : memref<1x64x32xbf16, #tpu.memory_space<vmem>>, vector<1x64x32xbf16>,
      %cst_49 = arith.constant 0xFF800000 : f32
      %59 = vector.broadcast %cst_49 : f32 to vector<1x64x1xf32>
      %c0_50 = arith.constant 0 : index
      %c0_51 = arith.constant 0 : index
      %c0_52 = arith.constant 0 : index
      %60 = vector.load %arg18[%c0_50, %c0_51, %c0_52] : memref<1x64x1xf32, #tpu.memory_space<vmem>>, vector<1x64x1xf32>
      tpu.vector_store %arg18[%c0_50, %c0_51, %c0_52], %59 {strides = array<i32>} : memref<1x64x1xf32, #tpu.memory_space<vmem>>, vector<1x64x1xf32>,
      %cst_53 = arith.constant 0.000000e+00 : f32
      %61 = vector.broadcast %cst_53 : f32 to vector<1x64x1xf32>
      %c0_54 = arith.constant 0 : index
      %c0_55 = arith.constant 0 : index
      %c0_56 = arith.constant 0 : index
      %62 = vector.load %arg19[%c0_54, %c0_55, %c0_56] : memref<1x64x1xf32, #tpu.memory_space<vmem>>, vector<1x64x1xf32>
      tpu.vector_store %arg19[%c0_54, %c0_55, %c0_56], %61 {strides = array<i32>} : memref<1x64x1xf32, #tpu.memory_space<vmem>>, vector<1x64x1xf32>,
      %cst_57 = arith.constant 0.000000e+00 : f32
      %63 = vector.broadcast %cst_57 : f32 to vector<1x64x32xf32>
      %c0_58 = arith.constant 0 : index
      %c0_59 = arith.constant 0 : index
      %c0_60 = arith.constant 0 : index
      %64 = vector.load %arg20[%c0_58, %c0_59, %c0_60] : memref<1x64x32xf32, #tpu.memory_space<vmem>>, vector<1x64x32xf32>
      tpu.vector_store %arg20[%c0_58, %c0_59, %c0_60], %63 {strides = array<i32>} : memref<1x64x32xf32, #tpu.memory_space<vmem>>, vector<1x64x32xf32>,
    } else {
    }
    %c0 = arith.constant 0 : index
    %c0_1 = arith.constant 0 : index
    %c0_2 = arith.constant 0 : index
    %3 = vector.load %arg3[%c0, %c0_1, %c0_2] : memref<1x32x32xf32, #tpu.memory_space<vmem>>, vector<1x32x32xf32>
    %4 = vector.shape_cast %3 : vector<1x32x32xf32> to vector<32x32xf32>
    %5 = arith.truncf %4 : vector<32x32xf32> to vector<32x32xbf16>
    %c0_3 = arith.constant 0 : index
    %c0_4 = arith.constant 0 : index
    %6 = vector.load %arg6[%c0_3, %c0_4] : memref<32x32xbf16, #tpu.memory_space<vmem>>, vector<32x32xbf16>
    %cst = arith.constant dense<0.000000e+00> : vector<32x32xf32>
    %7 = tpu.matmul %5, %6, %cst {dimension_numbers = #tpu.dot_dimension_numbers<[1], [0], [0], [1], [0, 0, 1, 1], [], []>} : vector<32x32xbf16>, vector<32x32xbf16>, vector<32x32xf32> -> vector<32x32xf32>
    %c0_5 = arith.constant 0 : index
    %c0_6 = arith.constant 0 : index
    %8 = vector.load %arg7[%c0_5, %c0_6] : memref<1x32xf32, #tpu.memory_space<vmem>>, vector<1x32xf32>
    %9 = vector.broadcast %8 : vector<1x32xf32> to vector<32x32xf32>
    %10 = arith.addf %7, %9 : vector<32x32xf32>
    %c0_7 = arith.constant 0 : index
    %c0_8 = arith.constant 0 : index
    %11 = vector.load %arg8[%c0_7, %c0_8] : memref<32x32xbf16, #tpu.memory_space<vmem>>, vector<32x32xbf16>
    %cst_9 = arith.constant dense<0.000000e+00> : vector<32x32xf32>
    %12 = tpu.matmul %5, %11, %cst_9 {dimension_numbers = #tpu.dot_dimension_numbers<[1], [0], [0], [1], [0, 0, 1, 1], [], []>} : vector<32x32xbf16>, vector<32x32xbf16>, vector<32x32xf32> -> vector<32x32xf32>
    %c0_10 = arith.constant 0 : index
    %c0_11 = arith.constant 0 : index
    %13 = vector.load %arg9[%c0_10, %c0_11] : memref<1x32xf32, #tpu.memory_space<vmem>>, vector<1x32xf32>
    %14 = vector.broadcast %13 : vector<1x32xf32> to vector<32x32xf32>
    %15 = arith.addf %12, %14 : vector<32x32xf32>
    %16 = vector.shape_cast %10 : vector<32x32xf32> to vector<1x32x32xf32>
    %17 = arith.truncf %16 : vector<1x32x32xf32> to vector<1x32x32xbf16>
    %18 = vector.shape_cast %15 : vector<32x32xf32> to vector<1x32x32xf32>
    %19 = arith.truncf %18 : vector<1x32x32xf32> to vector<1x32x32xbf16>
    %c0_12 = arith.constant 0 : index
    %c0_13 = arith.constant 0 : index
    %c0_14 = arith.constant 0 : index
    %20 = vector.load %arg17[%c0_12, %c0_13, %c0_14] : memref<1x64x32xbf16, #tpu.memory_space<vmem>>, vector<1x64x32xbf16>
    "tpu.trace_start"() <{level = 10 : i32, message = "bnc,bmc->bnm"}> : () -> ()
    %cst_15 = arith.constant dense<0.000000e+00> : vector<1x64x32xf32>
    %21 = tpu.matmul %20, %17, %cst_15 {dimension_numbers = #tpu.dot_dimension_numbers<[2], [2], [1], [1], [0, 0, 0, 1, 1, 1], [0], [0]>} : vector<1x64x32xbf16>, vector<1x32x32xbf16>, vector<1x64x32xf32> -> vector<1x64x32xf32>
    "tpu.trace_stop"() : () -> ()
    %c0_16 = arith.constant 0 : index
    %c0_17 = arith.constant 0 : index
    %c0_18 = arith.constant 0 : index
    %22 = vector.load %arg18[%c0_16, %c0_17, %c0_18] : memref<1x64x1xf32, #tpu.memory_space<vmem>>, vector<1x64x1xf32>
    %cst_19 = arith.constant dense<0xFF800000> : vector<1x64xf32>
    %23 = vector.multi_reduction <maximumf>, %21, %cst_19 [2] : vector<1x64x32xf32> to vector<1x64xf32>
    %24 = vector.shape_cast %23 : vector<1x64xf32> to vector<1x64x1xf32>
    %25 = arith.maximumf %22, %24 : vector<1x64x1xf32>
    %26 = arith.subf %22, %25 : vector<1x64x1xf32>
    %27 = math.exp %26 : vector<1x64x1xf32>
    %28 = vector.broadcast %25 : vector<1x64x1xf32> to vector<1x64x32xf32>
    %29 = arith.subf %21, %28 : vector<1x64x32xf32>
    %30 = math.exp %29 : vector<1x64x32xf32>
    %c0_20 = arith.constant 0 : index
    %c0_21 = arith.constant 0 : index
    %c0_22 = arith.constant 0 : index
    %31 = vector.load %arg19[%c0_20, %c0_21, %c0_22] : memref<1x64x1xf32, #tpu.memory_space<vmem>>, vector<1x64x1xf32>
    %32 = arith.mulf %27, %31 : vector<1x64x1xf32>
    %cst_23 = arith.constant dense<0.000000e+00> : vector<1x64xf32>
    %33 = vector.multi_reduction <add>, %30, %cst_23 [2] : vector<1x64x32xf32> to vector<1x64xf32>
    %34 = vector.shape_cast %33 : vector<1x64xf32> to vector<1x64x1xf32>
    %35 = arith.addf %32, %34 : vector<1x64x1xf32>
    %c0_24 = arith.constant 0 : index
    %c0_25 = arith.constant 0 : index
    %c0_26 = arith.constant 0 : index
    %36 = vector.load %arg19[%c0_24, %c0_25, %c0_26] : memref<1x64x1xf32, #tpu.memory_space<vmem>>, vector<1x64x1xf32>
    tpu.vector_store %arg19[%c0_24, %c0_25, %c0_26], %35 {strides = array<i32>} : memref<1x64x1xf32, #tpu.memory_space<vmem>>, vector<1x64x1xf32>,
    %c0_27 = arith.constant 0 : index
    %c0_28 = arith.constant 0 : index
    %c0_29 = arith.constant 0 : index
    %37 = vector.load %arg20[%c0_27, %c0_28, %c0_29] : memref<1x64x32xf32, #tpu.memory_space<vmem>>, vector<1x64x32xf32>
    %38 = vector.broadcast %27 : vector<1x64x1xf32> to vector<1x64x32xf32>
    %39 = arith.mulf %38, %37 : vector<1x64x32xf32>
    %40 = arith.truncf %30 : vector<1x64x32xf32> to vector<1x64x32xbf16>
    "tpu.trace_start"() <{level = 10 : i32, message = "bnm,bmc->bnc"}> : () -> ()
    %cst_30 = arith.constant dense<0.000000e+00> : vector<1x64x32xf32>
    %41 = tpu.matmul %40, %19, %cst_30 {dimension_numbers = #tpu.dot_dimension_numbers<[2], [1], [1], [2], [0, 0, 0, 1, 1, 2], [0], [0]>} : vector<1x64x32xbf16>, vector<1x32x32xbf16>, vector<1x64x32xf32> -> vector<1x64x32xf32>
    "tpu.trace_stop"() : () -> ()
    %42 = arith.addf %39, %41 : vector<1x64x32xf32>
    %c0_31 = arith.constant 0 : index
    %c0_32 = arith.constant 0 : index
    %c0_33 = arith.constant 0 : index
    %43 = vector.load %arg20[%c0_31, %c0_32, %c0_33] : memref<1x64x32xf32, #tpu.memory_space<vmem>>, vector<1x64x32xf32>
    tpu.vector_store %arg20[%c0_31, %c0_32, %c0_33], %42 {strides = array<i32>} : memref<1x64x32xf32, #tpu.memory_space<vmem>>, vector<1x64x32xf32>,
    %c0_34 = arith.constant 0 : index
    %c0_35 = arith.constant 0 : index
    %c0_36 = arith.constant 0 : index
    %44 = vector.load %arg18[%c0_34, %c0_35, %c0_36] : memref<1x64x1xf32, #tpu.memory_space<vmem>>, vector<1x64x1xf32>
    tpu.vector_store %arg18[%c0_34, %c0_35, %c0_36], %25 {strides = array<i32>} : memref<1x64x1xf32, #tpu.memory_space<vmem>>, vector<1x64x1xf32>,
    %c1_i32 = arith.constant 1 : i32
    %45 = arith.cmpi eq, %arg1, %c1_i32 : i32
    %46 = arith.extui %45 : i1 to i32
    %c0_i32_37 = arith.constant 0 : i32
    %47 = arith.cmpi ne, %46, %c0_i32_37 : i32
    scf.if %47 {
      %c0_38 = arith.constant 0 : index
      %c0_39 = arith.constant 0 : index
      %c0_40 = arith.constant 0 : index
      %48 = vector.load %arg20[%c0_38, %c0_39, %c0_40] : memref<1x64x32xf32, #tpu.memory_space<vmem>>, vector<1x64x32xf32>
      %c0_41 = arith.constant 0 : index
      %c0_42 = arith.constant 0 : index
      %c0_43 = arith.constant 0 : index
      %49 = vector.load %arg19[%c0_41, %c0_42, %c0_43] : memref<1x64x1xf32, #tpu.memory_space<vmem>>, vector<1x64x1xf32>
      %50 = tpu.reciprocal %49 {approx = true} : vector<1x64x1xf32> -> vector<1x64x1xf32>
      %51 = vector.broadcast %50 : vector<1x64x1xf32> to vector<1x64x32xf32>
      %52 = arith.mulf %48, %51 : vector<1x64x32xf32>
      %53 = vector.shape_cast %52 : vector<1x64x32xf32> to vector<64x32xf32>
      %54 = arith.truncf %53 : vector<64x32xf32> to vector<64x32xbf16>
      %c0_44 = arith.constant 0 : index
      %c0_45 = arith.constant 0 : index
      %55 = vector.load %arg10[%c0_44, %c0_45] : memref<32x32xbf16, #tpu.memory_space<vmem>>, vector<32x32xbf16>
      %cst_46 = arith.constant dense<0.000000e+00> : vector<64x32xf32>
      %56 = tpu.matmul %54, %55, %cst_46 {dimension_numbers = #tpu.dot_dimension_numbers<[1], [0], [0], [1], [0, 0, 1, 1], [], []>} : vector<64x32xbf16>, vector<32x32xbf16>, vector<64x32xf32> -> vector<64x32xf32>
      %c0_47 = arith.constant 0 : index
      %c0_48 = arith.constant 0 : index
      %57 = vector.load %arg11[%c0_47, %c0_48] : memref<1x32xf32, #tpu.memory_space<vmem>>, vector<1x32xf32>
      %58 = vector.broadcast %57 : vector<1x32xf32> to vector<64x32xf32>
      %59 = arith.addf %56, %58 : vector<64x32xf32>
      %c0_49 = arith.constant 0 : index
      %c0_50 = arith.constant 0 : index
      %c0_51 = arith.constant 0 : index
      %60 = vector.load %arg2[%c0_49, %c0_50, %c0_51] : memref<1x64x32xf32, #tpu.memory_space<vmem>>, vector<1x64x32xf32>
      %61 = vector.shape_cast %59 : vector<64x32xf32> to vector<1x64x32xf32>
      %62 = arith.addf %60, %61 : vector<1x64x32xf32>
      %63 = vector.shape_cast %62 : vector<1x64x32xf32> to vector<64x32xf32>
      %64 = arith.truncf %63 : vector<64x32xf32> to vector<64x32xbf16>
      %c0_52 = arith.constant 0 : index
      %c0_53 = arith.constant 0 : index
      %65 = vector.load %arg12[%c0_52, %c0_53] : memref<32x64xbf16, #tpu.memory_space<vmem>>, vector<32x64xbf16>
      %cst_54 = arith.constant dense<0.000000e+00> : vector<64x64xf32>
      %66 = tpu.matmul %64, %65, %cst_54 {dimension_numbers = #tpu.dot_dimension_numbers<[1], [0], [0], [1], [0, 0, 1, 1], [], []>} : vector<64x32xbf16>, vector<32x64xbf16>, vector<64x64xf32> -> vector<64x64xf32>
      %c0_55 = arith.constant 0 : index
      %c0_56 = arith.constant 0 : index
      %67 = vector.load %arg13[%c0_55, %c0_56] : memref<1x64xf32, #tpu.memory_space<vmem>>, vector<1x64xf32>
      %68 = vector.broadcast %67 : vector<1x64xf32> to vector<64x64xf32>
      %69 = arith.addf %66, %68 : vector<64x64xf32>
      %cst_57 = arith.constant 5.000000e-01 : f32
      %70 = vector.broadcast %cst_57 : f32 to vector<64x64xf32>
      %71 = arith.mulf %70, %69 : vector<64x64xf32>
      %cst_58 = arith.constant 0.707106769 : f32
      %72 = vector.broadcast %cst_58 : f32 to vector<64x64xf32>
      %73 = arith.mulf %69, %72 : vector<64x64xf32>
      %74 = math.erf %73 : vector<64x64xf32>
      %cst_59 = arith.constant 1.000000e+00 : f32
      %75 = vector.broadcast %cst_59 : f32 to vector<64x64xf32>
      %76 = arith.addf %75, %74 : vector<64x64xf32>
      %77 = arith.mulf %71, %76 : vector<64x64xf32>
      %78 = arith.truncf %77 : vector<64x64xf32> to vector<64x64xbf16>
      %c0_60 = arith.constant 0 : index
      %c0_61 = arith.constant 0 : index
      %79 = vector.load %arg14[%c0_60, %c0_61] : memref<64x32xbf16, #tpu.memory_space<vmem>>, vector<64x32xbf16>
      %cst_62 = arith.constant dense<0.000000e+00> : vector<64x32xf32>
      %80 = tpu.matmul %78, %79, %cst_62 {dimension_numbers = #tpu.dot_dimension_numbers<[1], [0], [0], [1], [0, 0, 1, 1], [], []>} : vector<64x64xbf16>, vector<64x32xbf16>, vector<64x32xf32> -> vector<64x32xf32>
      %c0_63 = arith.constant 0 : index
      %c0_64 = arith.constant 0 : index
      %81 = vector.load %arg15[%c0_63, %c0_64] : memref<1x32xf32, #tpu.memory_space<vmem>>, vector<1x32xf32>
      %82 = vector.broadcast %81 : vector<1x32xf32> to vector<64x32xf32>
      %83 = arith.addf %80, %82 : vector<64x32xf32>
      %84 = vector.shape_cast %83 : vector<64x32xf32> to vector<1x64x32xf32>
      %85 = arith.addf %62, %84 : vector<1x64x32xf32>
      %c0_65 = arith.constant 0 : index
      %c0_66 = arith.constant 0 : index
      %c0_67 = arith.constant 0 : index
      %86 = vector.load %arg16[%c0_65, %c0_66, %c0_67] : memref<1x64x32xf32, #tpu.memory_space<vmem>>, vector<1x64x32xf32>
      tpu.vector_store %arg16[%c0_65, %c0_66, %c0_67], %85 {strides = array<i32>} : memref<1x64x32xf32, #tpu.memory_space<vmem>>, vector<1x64x32xf32>,
    } else {
    }
    return
  }
  func.func @transform_0(%arg0: i32, %arg1: i32) -> (i32, i32, i32) {
    %c0_i32 = arith.constant 0 : i32
    %c0_i32_0 = arith.constant 0 : i32
    %c0_i32_1 = arith.constant 0 : i32
    return %arg0, %c0_i32, %c0_i32_0 : i32, i32, i32
  }
  func.func @transform_1(%arg0: i32, %arg1: i32) -> (i32, i32, i32) {
    %c0_i32 = arith.constant 0 : i32
    %c0_i32_0 = arith.constant 0 : i32
    return %arg0, %arg1, %c0_i32 : i32, i32, i32
  }
  func.func @transform_2(%arg0: i32, %arg1: i32) -> (i32, i32) {
    %c0_i32 = arith.constant 0 : i32
    %c0_i32_0 = arith.constant 0 : i32
    %c0_i32_1 = arith.constant 0 : i32
    return %c0_i32, %c0_i32_0 : i32, i32
  }
  func.func @transform_3(%arg0: i32, %arg1: i32) -> (i32, i32) {
    %c0_i32 = arith.constant 0 : i32
    %c0_i32_0 = arith.constant 0 : i32
    %c0_i32_1 = arith.constant 0 : i32
    return %c0_i32, %c0_i32_0 : i32, i32
  }
  func.func @transform_4(%arg0: i32, %arg1: i32) -> (i32, i32) {
    %c0_i32 = arith.constant 0 : i32
    %c0_i32_0 = arith.constant 0 : i32
    %c0_i32_1 = arith.constant 0 : i32
    return %c0_i32, %c0_i32_0 : i32, i32
  }
  func.func @transform_5(%arg0: i32, %arg1: i32) -> (i32, i32) {
    %c0_i32 = arith.constant 0 : i32
    %c0_i32_0 = arith.constant 0 : i32
    %c0_i32_1 = arith.constant 0 : i32
    return %c0_i32, %c0_i32_0 : i32, i32
  }
  func.func @transform_6(%arg0: i32, %arg1: i32) -> (i32, i32) {
    %c0_i32 = arith.constant 0 : i32
    %c0_i32_0 = arith.constant 0 : i32
    %c0_i32_1 = arith.constant 0 : i32
    return %c0_i32, %c0_i32_0 : i32, i32
  }
  func.func @transform_7(%arg0: i32, %arg1: i32) -> (i32, i32) {
    %c0_i32 = arith.constant 0 : i32
    %c0_i32_0 = arith.constant 0 : i32
    %c0_i32_1 = arith.constant 0 : i32
    return %c0_i32, %c0_i32_0 : i32, i32
  }
  func.func @transform_8(%arg0: i32, %arg1: i32) -> (i32, i32) {
    %c0_i32 = arith.constant 0 : i32
    %c0_i32_0 = arith.constant 0 : i32
    %c0_i32_1 = arith.constant 0 : i32
    return %c0_i32, %c0_i32_0 : i32, i32
  }
  func.func @transform_9(%arg0: i32, %arg1: i32) -> (i32, i32) {
    %c0_i32 = arith.constant 0 : i32
    %c0_i32_0 = arith.constant 0 : i32
    %c0_i32_1 = arith.constant 0 : i32
    return %c0_i32, %c0_i32_0 : i32, i32
  }
  func.func @transform_10(%arg0: i32, %arg1: i32) -> (i32, i32) {
    %c0_i32 = arith.constant 0 : i32
    %c0_i32_0 = arith.constant 0 : i32
    %c0_i32_1 = arith.constant 0 : i32
    return %c0_i32, %c0_i32_0 : i32, i32
  }
  func.func @transform_11(%arg0: i32, %arg1: i32) -> (i32, i32) {
    %c0_i32 = arith.constant 0 : i32
    %c0_i32_0 = arith.constant 0 : i32
    %c0_i32_1 = arith.constant 0 : i32
    return %c0_i32, %c0_i32_0 : i32, i32
  }
  func.func @transform_12(%arg0: i32, %arg1: i32) -> (i32, i32) {
    %c0_i32 = arith.constant 0 : i32
    %c0_i32_0 = arith.constant 0 : i32
    %c0_i32_1 = arith.constant 0 : i32
    return %c0_i32, %c0_i32_0 : i32, i32
  }
  func.func @transform_13(%arg0: i32, %arg1: i32) -> (i32, i32) {
    %c0_i32 = arith.constant 0 : i32
    %c0_i32_0 = arith.constant 0 : i32
    %c0_i32_1 = arith.constant 0 : i32
    return %c0_i32, %c0_i32_0 : i32, i32
  }
  func.func @transform_14(%arg0: i32, %arg1: i32) -> (i32, i32, i32) {
    %c0_i32 = arith.constant 0 : i32
    %c0_i32_0 = arith.constant 0 : i32
    %c0_i32_1 = arith.constant 0 : i32
    return %arg0, %c0_i32, %c0_i32_0 : i32, i32, i32
  }
}

</mosaic_0001>

<bundles_post_ra>
// kernel: tpu_custom_call.1
= control target key start
LH: loop header
LB: loop body
LE: loop exit
PB: predicated region body
PF: predicated region fallthrough
CT: control target
= control target key end

     0   :  { %s2366_s29 = smov 0   ;;  %s2368_s30 = smov 0   ;;  %s2749_s0 = inlined_call_operand.vmem [shape: f32[2,64,32], index: 0, kind: input, shape index: {}]   ;;  %s2750_s1 = inlined_call_operand.vmem [shape: f32[2,64,32], index: 1, kind: input, shape index: {}]   ;;  %s2751_s2 = inlined_call_operand.vmem [shape: bf16[32,32], index: 2, kind: input, shape index: {}]   ;;  %s2752_s3 = inlined_call_operand.vmem [shape: f32[1,32], index: 3, kind: input, shape index: {}]   ;;  %s2753_s4 = inlined_call_operand.vmem [shape: bf16[32,32], index: 4, kind: input, shape index: {}]   ;;  %s2754_s5 = inlined_call_operand.vmem [shape: f32[1,32], index: 5, kind: input, shape index: {}]   ;;  %s2755_s6 = inlined_call_operand.vmem [shape: bf16[32,32], index: 6, kind: input, shape index: {}]   ;;  %s2756_s7 = inlined_call_operand.vmem [shape: f32[1,32], index: 7, kind: input, shape index: {}]   ;;  %s2757_s8 = inlined_call_operand.vmem [shape: bf16[32,32], index: 8, kind: input, shape index: {}]   ;;  %s2758_s9 = inlined_call_operand.vmem [shape: f32[1,32], index: 9, kind: input, shape index: {}]   ;;  %s2759_s10 = inlined_call_operand.vmem [shape: bf16[32,64], index: 10, kind: input, shape index: {}]   ;;  %s2760_s11 = inlined_call_operand.vmem [shape: f32[1,64], index: 11, kind: input, shape index: {}]   ;;  %s2761_s12 = inlined_call_operand.vmem [shape: bf16[64,32], index: 12, kind: input, shape index: {}]   ;;  %s2762_s13 = inlined_call_operand.vmem [shape: f32[1,32], index: 13, kind: input, shape index: {}]   ;;  %s2763_s14 = inlined_call_operand.vmem [shape: f32[2,64,32], index: 14, kind: output, shape index: {}]  }
   0x1   :  { %2767 = sst [smem:[#allocation11_spill]] %s2762_s13  ;;  %s2370_s15 = smov 0  }
   0x2   :  { %s2372_s16 = smov 0   ;;  %s2374_s17 = smov 0  }
   0x3 LB: > { %2768 = sst [smem:[#allocation6_spill]] %s2277_s15  ;;  %s33_s18 = sadd.s32 1, %s2277_s15  ;;  %s2285_s17 = sphi %s2374_s17, %s24_s17   ;;  %s2281_s16 = sphi %s2372_s16, %s2778_s16   ;;  %s2277_s15 = sphi %s2370_s15, %s2777_s15   ;;  %s2273_s30 = sphi %s2368_s30, %s2776_s30   ;;  %s2269_s29 = sphi %s2366_s29, %s2775_s29  }
   0x4   : > { %2769 = sst [smem:[#allocation7_spill]] %s2281_s16  ;;  %s36_s19 = sadd.s32 1, %s2281_s16 }
   0x5   : > { %2770 = sst [smem:[#allocation8_spill]] %s2285_s17  ;;  %p34_p0 = scmp.ge.s32.totalorder %s33_s18, 2 }
   0x6   : > { %p1883_p1 = scmp.ge.s32.totalorder %s2285_s17, 1  ;;  %p441_p2 = scmp.lt.s32.totalorder %s2285_s17, 5 }
   0x7   : > { %s2780_s18 = smov (%p34_p0, %s33_s18), 0  ;;  %s2782_s19 = smov (!%p34_p0, %s36_s19), %s2281_s16 }
   0x8   : > { %2771 = sst [smem:[#allocation9_spill]] %s2780_s18  ;;  %p442_p3 = pnand %p1883_p1, %p441_p2 }
   0x9   : > { %p38_p4 = scmp.ge.s32.totalorder %s2782_s19, 2  ;;  %p496_p5 = scmp.lt.s32.totalorder (!%p442_p3), %s2273_s30, 1 }
   0xa   : > { %445 = sbr.rel (%p442_p3) target bundleno = 1960 (0x7a8), region = 76  ;;  %s1886_s20 = sshll.u32 (!%p442_p3), %s2269_s29, 2 }
   0xb   : > { %s2784_s19 = smov (%p38_p4, %s2782_s19), 0  ;;  %p504_p6 = scmp.lt.s32.totalorder (!%p442_p3), %s1886_s20, 7 }
   0xc   : > { %2772 = sst [smem:[#allocation10_spill]] %s2784_s19  ;;  %p1891_p7 = scmp.ne.s32.totalorder (!%p442_p3), %s2269_s29, 0 }
   0xf   : > { %s2786_s30 = smov (!%p496_p5, %s2273_s30), 1  ;;  %s2788_s20 = smov (!%p504_p6, %s1886_s20), 7 }
  0x10   : > { %s1955_s21 = sshll.u32 %s2786_s30, 6  ;;  %s1887_s22 = sshll.u32 %s2786_s30, 3 }
  0x11   : > { %s2402_s25 = scalar_lea.vmem %s2749_s0, %s1955_s21  ;;  %s507_s26 = sadd.s32 %s1887_s22, %s2788_s20 }
  0x12   : > { %s1888_s27 = sshll.u32 %s507_s26, 3  ;;  %s2407_s19 = scalar_lea.vmem %s2763_s14, %s1955_s21 }
  0x13   : > { %s2412_s17 = scalar_lea.vmem %s2750_s1, %s1888_s27  ;;  %520 = sbr.rel (%p1891_p7) target bundleno = 237 (0xed), region = 80 }
  0x18   : > { %v2161_v0 = vld [vmem:[%s2751_s2 + $0x8] sm:$0xff]   ;;  %v2162_v1 = vld [vmem:[%s2751_s2] sm:$0xff]   ;;  %vm675_vm0 = vcmask 7168   ;;  %vm556_vm1 = vcmask 261120   ;;  %v2287_v6 = vmov -inf   ;;  %v2288_v7 = vmov 0.0  }
  0x19   : > { %2011 = vmatprep.subr.bf16.mxu0 %v2161_v0  ;;  %2103 = vmatprep.subr.bf16.mxu1 %v2161_v0  ;;  %v521_v2 = vld [vmem:[%s2402_s25] sm:$0xff]  ;;  %v522_v3 = vld [vmem:[%s2402_s25 + $0x8] sm:$0xff]  ;;  %676 = vst.msk [vmem:[#allocation3] sm:$0xff] %vm675_vm0, %v2287_v6  ;;  %677 = vst.msk [vmem:[#allocation3 + $0x8] sm:$0xff] %vm675_vm0, %v2287_v6  ;;  %vm666_vm2 = vcmask 257024  }
  0x1a   : > { %v525_v4 = vld [vmem:[%s2402_s25 + $0x20] sm:$0xff]  ;;  %2012 = vmatpush3.bf16.msra.mxu0 %v2161_v0  ;;  %2105 = vmatpush3.bf16.msra.mxu1 %v2161_v0  ;;  %v529_v5 = vpack.c.bf16 %v522_v3, %v521_v2  ;;  %678 = vst.msk [vmem:[#allocation3 + $0x10] sm:$0xff] %vm675_vm0, %v2287_v6  ;;  %679 = vst.msk [vmem:[#allocation3 + $0x18] sm:$0xff] %vm675_vm0, %v2287_v6  ;;  %v526_v8 = vld [vmem:[%s2402_s25 + $0x28] sm:$0xff] }
  0x1b   : > { %680 = vst.msk [vmem:[#allocation3 + $0x20] sm:$0xff] %vm675_vm0, %v2287_v6  ;;  %681 = vst.msk [vmem:[#allocation3 + $0x28] sm:$0xff] %vm675_vm0, %v2287_v6  ;;  %v523_v9 = vld [vmem:[%s2402_s25 + $0x10] sm:$0xff]  ;;  %v524_v10 = vld [vmem:[%s2402_s25 + $0x18] sm:$0xff]  ;;  %2013 = vmatprep.subr.bf16.mxu0 %v2162_v1  ;;  %2104 = vmatprep.subr.bf16.mxu1 %v2162_v1  ;;  %v531_v11 = vpack.c.bf16 %v526_v8, %v525_v4 }
  0x1c   : > { %682 = vst.msk [vmem:[#allocation3 + $0x30] sm:$0xff] %vm675_vm0, %v2287_v6  ;;  %683 = vst.msk [vmem:[#allocation3 + $0x38] sm:$0xff] %vm675_vm0, %v2287_v6  ;;  %v527_v12 = vld [vmem:[%s2402_s25 + $0x30] sm:$0xff]  ;;  %v528_v13 = vld [vmem:[%s2402_s25 + $0x38] sm:$0xff]  ;;  %2015 = vmatprep.mubr.msk.bf16.mxu0 %vm556_vm1, %v529_v5  ;;  %v530_v14 = vpack.c.bf16 %v524_v10, %v523_v9 }
  0x1d   : > { %684 = vst.msk [vmem:[#allocation4] sm:$0xff] %vm675_vm0, %v2288_v7  ;;  %685 = vst.msk [vmem:[#allocation4 + $0x8] sm:$0xff] %vm675_vm0, %v2288_v7  ;;  %2019 = vmatprep.mubr.msk.bf16.mxu1 %vm556_vm1, %v531_v11  ;;  %v532_v15 = vpack.c.bf16 %v528_v13, %v527_v12  ;;  %v1892_v16 = vld [vmem:[%s2752_s3] ss:$0 sm:$0xff] }
  0x1e   : > { %686 = vst.msk [vmem:[#allocation4 + $0x10] sm:$0xff] %vm675_vm0, %v2288_v7  ;;  %687 = vst.msk [vmem:[#allocation4 + $0x18] sm:$0xff] %vm675_vm0, %v2288_v7  ;;  %2014 = vmatpush3.bf16.msra.mxu0 %v2162_v1  ;;  %2106 = vmatpush3.bf16.msra.mxu1 %v2162_v1 }
  0x1f   : > { %688 = vst.msk [vmem:[#allocation4 + $0x20] sm:$0xff] %vm675_vm0, %v2288_v7  ;;  %689 = vst.msk [vmem:[#allocation4 + $0x28] sm:$0xff] %vm675_vm0, %v2288_v7 }
  0x20   : > { %690 = vst.msk [vmem:[#allocation4 + $0x30] sm:$0xff] %vm675_vm0, %v2288_v7  ;;  %691 = vst.msk [vmem:[#allocation4 + $0x38] sm:$0xff] %vm675_vm0, %v2288_v7 }
  0x21   : > { %692 = vst.msk [vmem:[#allocation5] sm:$0xff] %vm556_vm1, %v2288_v7  ;;  %693 = vst.msk [vmem:[#allocation5 + $0x8] sm:$0xff] %vm556_vm1, %v2288_v7  ;;  %2016 = vmatmul.mubr.msk.bf16.vlgmr.msra.gmra.mxu0 %vm556_vm1, %v530_v14  ;;  %2020 = vmatmul.mubr.msk.bf16.vlgmr.msra.gmra.mxu1 %vm556_vm1, %v532_v15 }
  0x22   : > { %694 = vst.msk [vmem:[#allocation5 + $0x10] sm:$0xff] %vm556_vm1, %v2288_v7  ;;  %695 = vst.msk [vmem:[#allocation5 + $0x18] sm:$0xff] %vm556_vm1, %v2288_v7 }
  0x23   : > { %696 = vst.msk [vmem:[#allocation5 + $0x20] sm:$0xff] %vm556_vm1, %v2288_v7  ;;  %697 = vst.msk [vmem:[#allocation5 + $0x28] sm:$0xff] %vm556_vm1, %v2288_v7 }
  0x24   : > { %698 = vst.msk [vmem:[#allocation5 + $0x30] sm:$0xff] %vm556_vm1, %v2288_v7  ;;  %699 = vst.msk [vmem:[#allocation5 + $0x38] sm:$0xff] %vm556_vm1, %v2288_v7 }
  0xe1   : > { %v2017_v17 = vpop.f32.mrf.mxu0  ;;  %v2021_v18 = vpop.f32.mrf.mxu1 }
  0xe2   : > { %v612_v19 = vadd.f32 %v2017_v17, %v1892_v16  ;;  %v628_v20 = vadd.f32 %v2021_v18, %v1892_v16 }
  0xe3   : > { %v603_v21 = vpop.f32.mrf.mxu0  ;;  %v619_v22 = vpop.f32.mrf.mxu1 }
  0xe4   : > { %v1959_v23 = vpack.c.bf16 %v612_v19, %v612_v19  ;;  %v1963_v24 = vpack.c.bf16 %v628_v20, %v628_v20  ;;  %v604_v25 = vadd.f32 %v1892_v16, %v603_v21  ;;  %v620_v26 = vadd.f32 %v1892_v16, %v619_v22 }
  0xe5   : > { %v2018_v27 = vpop.f32.mrf.mxu0  ;;  %v2022_v28 = vpop.f32.mrf.mxu1 }
  0xe6   : > { %669 = vst.msk [vmem:[#allocation2 + $0x8] sm:$0xf] %vm666_vm2, %v1959_v23  ;;  %673 = vst.msk [vmem:[#allocation2 + $0x18] sm:$0xf] %vm666_vm2, %v1963_v24  ;;  %v1957_v29 = vpack.c.bf16 %v604_v25, %v604_v25  ;;  %v1961_v30 = vpack.c.bf16 %v620_v26, %v620_v26  ;;  %v615_v31 = vadd.f32 %v2018_v27, %v1892_v16 }
  0xe7   : > { %v631_v32 = vadd.f32 %v2022_v28, %v1892_v16  ;;  %v606_v33 = vpop.f32.mrf.mxu0  ;;  %v622_v34 = vpop.f32.mrf.mxu1 }
  0xe8   : > { %667 = vst.msk [vmem:[#allocation2] sm:$0xf] %vm666_vm2, %v1957_v29  ;;  %671 = vst.msk [vmem:[#allocation2 + $0x10] sm:$0xf] %vm666_vm2, %v1961_v30  ;;  %v1960_v35 = vpack.c.bf16 %v615_v31, %v615_v31  ;;  %v607_v37 = vadd.f32 %v1892_v16, %v606_v33  ;;  %v623_v38 = vadd.f32 %v1892_v16, %v622_v34 }
  0xe9   : > { %v1964_v36 = vpack.c.bf16 %v631_v32, %v631_v32 }
  0xea   : > { %670 = vst.msk [vmem:[#allocation2 + $0xc] sm:$0xf] %vm666_vm2, %v1960_v35  ;;  %v1958_v39 = vpack.c.bf16 %v607_v37, %v607_v37  ;;  %v1962_v40 = vpack.c.bf16 %v623_v38, %v623_v38 }
  0xeb   : > { %674 = vst.msk [vmem:[#allocation2 + $0x1c] sm:$0xf] %vm666_vm2, %v1964_v36 }
  0xec   : > { %668 = vst.msk [vmem:[#allocation2 + $0x4] sm:$0xf] %vm666_vm2, %v1958_v39  ;;  %672 = vst.msk [vmem:[#allocation2 + $0x14] sm:$0xf] %vm666_vm2, %v1962_v40 }
  0xed PF: > { %v2165_v41 = vld [vmem:[%s2753_s4 + $0x8] sm:$0xff]   ;;  %v2166_v42 = vld [vmem:[%s2753_s4] sm:$0xff]   ;;  %vm729_vm3 = vcmask 261120   ;;  %v702_v45 = vld [vmem:[%s2412_s17 + $0x10] sm:$0xff]  ;;  %v2289_v16 = vmov 0   ;;  %vm1148_vm4 = vcmask 7168  }
  0xee   : > { %2023 = vmatprep.subr.bf16.mxu0 %v2165_v41  ;;  %v700_v43 = vld [vmem:[%s2412_s17] sm:$0xff]  ;;  %v701_v44 = vld [vmem:[%s2412_s17 + $0x8] sm:$0xff]  ;;  %v703_v47 = vld [vmem:[%s2412_s17 + $0x18] sm:$0xff]  ;;  %2164 = vset.pattern.permute.xlu1 %v2289_v16  ;;  %p1929_p8 = scmp.ne.s32.totalorder %s2269_s29, 1 }
  0xef   : > { %2024 = vmatpush3.bf16.msra.mxu0 %v2165_v41  ;;  %v704_v46 = vpack.c.bf16 %v701_v44, %v700_v43  ;;  %v705_v48 = vpack.c.bf16 %v703_v47, %v702_v45  ;;  %v1907_v51 = vld [vmem:[%s2754_s5] ss:$0 sm:$0xff]  ;;  %v2171_v2 = vld [vmem:[%s2755_s6 + $0x8] sm:$0xff]   ;;  %2163 = vset.pattern.permute.xlu0 %v2289_v16  ;;  %v974_v21 = vld [vmem:[#allocation3 + $0x10] sm:$0xff]  ;;  %s2773_s23 = sld [smem:[#allocation11_spill]] (!%p1929_p8) }
  0xf0   : > { %2025 = vmatprep.subr.bf16.mxu0 %v2166_v42  ;;  %v2172_v3 = vld [vmem:[%s2755_s6] sm:$0xff]   ;;  %2031 = vmatprep.subr.bf16.mxu1 %v2171_v2  ;;  %v975_v26 = vld [vmem:[#allocation3 + $0x18] sm:$0xff]  ;;  %v973_v29 = vld [vmem:[#allocation3 + $0x8] sm:$0xff] }
  0xf1   : > { %2027 = vmatprep.mubr.msk.bf16.mxu0 %vm729_vm3, %v704_v46  ;;  %2035 = vmatprep.mubr.msk.bf16.mxu1 %vm729_vm3, %v704_v46  ;;  %v2168_v63 = vld [vmem:[#allocation2 + $0x8] sm:$0xff]   ;;  %v972_v23 = vld [vmem:[#allocation3] sm:$0xff] }
  0xf2   : > { %v2170_v1 = vld [vmem:[#allocation2 + $0x18] sm:$0xff]   ;;  %2032 = vmatpush3.bf16.msra.mxu1 %v2171_v2  ;;  %v976_v36 = vld [vmem:[#allocation3 + $0x20] sm:$0xff]  ;;  %v977_v43 = vld [vmem:[#allocation3 + $0x28] sm:$0xff] }
  0xf3   : > { %2026 = vmatpush3.bf16.msra.mxu0 %v2166_v42  ;;  %v2167_v49 = vld [vmem:[#allocation2] sm:$0xff]   ;;  %v2169_v0 = vld [vmem:[#allocation2 + $0x10] sm:$0xff]   ;;  %2033 = vmatprep.subr.bf16.mxu1 %v2172_v3 }
  0xf4   : > { %v2535_v42 = vld [vmem:[#allocation3 + $0x30] sm:$0xff]  ;;  %v1912_v44 = vld [vmem:[%s2756_s7] ss:$0 sm:$0xff] }
  0xf6   : > { %2028 = vmatmul.mubr.msk.bf16.vlgmr.msra.gmra.mxu0 %vm729_vm3, %v705_v48  ;;  %2034 = vmatpush3.bf16.msra.mxu1 %v2172_v3 }
  0xf7   : > { %2043 = vmatprep.mubr.msk.bf16.mxu0 %vm729_vm3, %v2167_v49 }
  0xf9   : > { %2036 = vmatmul.mubr.msk.bf16.vlgmr.msra.gmra.mxu1 %vm729_vm3, %v705_v48 }
 0x1b6   : > { %v2029_v50 = vpop.f32.mrf.mxu0 }
 0x1b7   : > { %v779_v54 = vadd.f32 %v2029_v50, %v1907_v51 }
 0x1b8   : > { %v770_v52 = vpop.f32.mrf.mxu0 }
 0x1b9   : > { %v771_v57 = vadd.f32 %v1907_v51, %v770_v52  ;;  %v2037_v41 = vpop.f32.mrf.mxu1 }
 0x1ba   : > { %v2030_v53 = vpop.f32.mrf.mxu0  ;;  %v851_v52 = vadd.f32 %v2037_v41, %v1912_v44 }
 0x1bb   : > { %v782_v55 = vadd.f32 %v2030_v53, %v1907_v51  ;;  %v842_v45 = vpop.f32.mrf.mxu1  ;;  %v2544_v53 = vld [vmem:[#allocation3 + $0x38] sm:$0xff] }
 0x1bc   : > { %v773_v56 = vpop.f32.mrf.mxu0 }
 0x1bd   : > { %v858_v58 = vpack.c.bf16 %v782_v55, %v779_v54  ;;  %v774_v59 = vadd.f32 %v1907_v51, %v773_v56  ;;  %v2038_v54 = vpop.f32.mrf.mxu1 }
 0x1bf   : > { %v857_v60 = vpack.c.bf16 %v774_v59, %v771_v57  ;;  %2115 = vmatprep.subr.msk.bf16.mxu0 %vm729_vm3, %v858_v58  ;;  %v905_v61 = vsel %vm729_vm3, %v858_v58, 0  ;;  %v854_v57 = vadd.f32 %v2038_v54, %v1912_v44 }
 0x1c0   : > { %2040 = vmatpush3.bf16.xpose.msra.mxu0 %v905_v61 }
 0x1c1   : > { %2116 = vmatprep.subr.msk.bf16.mxu0 %vm729_vm3, %v857_v60  ;;  %v902_v62 = vsel %vm729_vm3, %v857_v60, 0 }
 0x1c8   : > { %2042 = vmatpush3.bf16.xpose.msra.mxu0 %v902_v62 }
 0x1cf   : > { %2044 = vmatmul.mubr.msk.bf16.vlgmr.msra.gmra.mxu0 %vm729_vm3, %v2168_v63  ;;  %v843_v63 = vadd.f32 %v1912_v44, %v842_v45 }
 0x1d0   : > { %2047 = vmatprep.mubr.msk.bf16.mxu0 %vm729_vm3, %v2169_v0  ;;  %v860_v0 = vpack.c.bf16 %v854_v57, %v851_v52 }
 0x1d2   : > { %2051 = vmatprep.subr.bf16.mxu1 %v860_v0 }
 0x1d3   : > { %2052 = vmatpush3.bf16.msra.mxu1 %v860_v0 }
 0x1d7   : > { %2048 = vmatmul.mubr.msk.bf16.gmra.mxu0 %vm729_vm3, %v2170_v1  ;;  %v845_v1 = vpop.f32.mrf.mxu1 }
 0x1d8   : > { %v846_v3 = vadd.f32 %v1912_v44, %v845_v1 }
 0x28f   : > { %v2499_v4 = vpop.f32.mrf.mxu0 }
 0x290   : > { %v986_v5 = vsel %vm729_vm3, %v2499_v4, -inf }
 0x291   : > { %987 = vmax.xlane.f32.xlu1 %v986_v5  ;;  %v2503_v6 = vpop.f32.mrf.mxu0 }
 0x292   : > { %v980_v7 = vsel %vm729_vm3, %v2503_v6, -inf }
 0x293   : > { %981 = vmax.xlane.f32.xlu0 %v980_v7  ;;  %v2507_v8 = vpop.f32.mrf.mxu0 }
 0x294   : > { %v989_v9 = vsel %vm729_vm3, %v2507_v8, -inf }
 0x295   : > { %990 = vmax.xlane.f32.xlu1 %v989_v9  ;;  %v2511_v10 = vpop.f32.mrf.mxu0  ;;  %v859_v9 = vpack.c.bf16 %v846_v3, %v843_v63 }
 0x296   : > { %v983_v11 = vsel %vm729_vm3, %v2511_v10, -inf }
 0x297   : > { %984 = vmax.xlane.f32.xlu0 %v983_v11  ;;  %v2515_v12 = vpop.f32.mrf.mxu0  ;;  %2053 = vmatprep.subr.bf16.mxu1 %v859_v9 }
 0x298   : > { %v998_v18 = vsel %vm729_vm3, %v2515_v12, -inf  ;;  %2054 = vmatpush3.bf16.msra.mxu1 %v859_v9 }
 0x299   : > { %v2517_v13 = vpop.f32.mrf.mxu0 }
 0x29a   : > { %v992_v14 = vsel %vm729_vm3, %v2517_v13, -inf }
 0x29b   : > { %993 = vmax.xlane.f32.xlu0 %v992_v14  ;;  %v2521_v15 = vpop.f32.mrf.mxu0 }
 0x29c   : > { %v1001_v20 = vsel %vm729_vm3, %v2521_v15, -inf }
 0x29d   : > { %v2523_v17 = vpop.f32.mrf.mxu0 }
 0x29e   : > { %v995_v19 = vsel %vm729_vm3, %v2523_v17, -inf }
 0x29f   : > { %999 = vmax.xlane.f32.xlu0 %v998_v18  ;;  %996 = vmax.xlane.f32.xlu1 %v995_v19 }
 0x2a3   : > { %1002 = vmax.xlane.f32.xlu1 %v1001_v20 }
 0x31a   : > { %v988_v22 = vpop.xlane.xlu1 %987 }
 0x31b   : > { %v1006_v24 = vmax.f32 %v974_v21, %v988_v22 }
 0x31c   : > { %v982_v25 = vpop.xlane.xlu0 %981 }
 0x31d   : > { %1312 = vst.msk [vmem:[#allocation3 + $0x10] sm:$0xff] %vm1148_vm4, %v1006_v24  ;;  %v1004_v27 = vmax.f32 %v972_v23, %v982_v25  ;;  %1048 = vperm.xlu1 %2164, %v1006_v24   ;;  %v1014_v38 = vsub.f32 %v974_v21, %v1006_v24 }
 0x31e   : > { %v991_v28 = vpop.xlane.xlu1 %990 }
 0x31f   : > { %v1012_v30 = vsub.f32 %v972_v23, %v1004_v27  ;;  %1310 = vst.msk [vmem:[#allocation3] sm:$0xff] %vm1148_vm4, %v1004_v27  ;;  %v1007_v31 = vmax.f32 %v975_v26, %v991_v28  ;;  %1038 = vperm.xlu0 %2163, %v1004_v27   ;;  %v1024_v46 = vmul.f32 1.442695, %v1014_v38 }
 0x320   : > { %v985_v32 = vpop.xlane.xlu0 %984 }
 0x321   : > { %v1020_v33 = vmul.f32 1.442695, %v1012_v30  ;;  %v1015_v34 = vsub.f32 %v975_v26, %v1007_v31  ;;  %1313 = vst.msk [vmem:[#allocation3 + $0x18] sm:$0xff] %vm1148_vm4, %v1007_v31  ;;  %v1005_v35 = vmax.f32 %v973_v29, %v985_v32  ;;  %1053 = vperm.xlu1 %2164, %v1007_v31  }
 0x323   : > { %2173 = vpow2.f32 %v1020_v33  ;;  %v1026_v37 = vmul.f32 1.442695, %v1015_v34  ;;  %1311 = vst.msk [vmem:[#allocation3 + $0x8] sm:$0xff] %vm1148_vm4, %v1005_v35  ;;  %v1013_v47 = vsub.f32 %v973_v29, %v1005_v35 }
 0x324   : > { %v994_v39 = vpop.xlane.xlu0 %993 }
 0x325   : > { %v1008_v40 = vmax.f32 %v976_v36, %v994_v39  ;;  %1043 = vperm.xlu1 %2164, %v1005_v35   ;;  %2175 = vpow2.f32 %v1026_v37  ;;  %v1022_v58 = vmul.f32 1.442695, %v1013_v47 }
 0x326   : > { %2177 = vpow2.f32 %v1024_v46 }
 0x327   : > { %1314 = vst.msk [vmem:[#allocation3 + $0x20] sm:$0xff] %vm1148_vm4, %v1008_v40  ;;  %v1016_v59 = vsub.f32 %v976_v36, %v1008_v40 }
 0x328   : > { %v1000_v48 = vpop.xlane.xlu0 %999  ;;  %v997_v49 = vpop.xlane.xlu1 %996 }
 0x329   : > { %v2542_v50 = vmax.f32 %v2535_v42, %v1000_v48  ;;  %v1009_v51 = vmax.f32 %v977_v43, %v997_v49  ;;  %v1028_v7 = vmul.f32 1.442695, %v1016_v59 }
 0x32b   : > { %v1018_v55 = vsub.f32 %v2535_v42, %v2542_v50  ;;  %1316 = vst.msk [vmem:[#allocation3 + $0x30] sm:$0xff] %vm1148_vm4, %v2542_v50  ;;  %v1017_v56 = vsub.f32 %v977_v43, %v1009_v51  ;;  %1315 = vst.msk [vmem:[#allocation3 + $0x28] sm:$0xff] %vm1148_vm4, %v1009_v51  ;;  %1068 = vperm.xlu1 %2164, %v2542_v50  }
 0x32c   : > { %v1003_v60 = vpop.xlane.xlu1 %1002 }
 0x32d   : > { %v1030_v61 = vmul.f32 1.442695, %v1017_v56  ;;  %v2553_v62 = vmax.f32 %v2544_v53, %v1003_v60  ;;  %v1032_v60 = vmul.f32 1.442695, %v1018_v55 }
 0x32f   : > { %v1019_v2 = vsub.f32 %v2544_v53, %v2553_v62  ;;  %1317 = vst.msk [vmem:[#allocation3 + $0x38] sm:$0xff] %vm1148_vm4, %v2553_v62  ;;  %1058 = vperm.xlu1 %2164, %v1008_v40   ;;  %2179 = vpow2.f32 %v1030_v61 }
 0x330   : > { %v2559_v5 = vpop.eup %2173  ;;  %2181 = vpow2.f32 %v1022_v58 }
 0x331   : > { %1167 = vperm.xlu0 %2163, %v2559_v5   ;;  %2183 = vpow2.f32 %v1028_v7  ;;  %v1034_v56 = vmul.f32 1.442695, %v1019_v2  ;;  %v1102_v7 = vld [vmem:[#allocation4 + $0x10] sm:$0xff] }
 0x332   : > { %v2562_v11 = vpop.eup %2175 }
 0x333   : > { %1063 = vperm.xlu1 %2164, %v1009_v51   ;;  %v2566_v14 = vpop.eup %2177 }
 0x334   : > { %v1110_v42 = vmul.f32 %v2566_v14, %v1102_v7 }
 0x335   : > { %1182 = vperm.xlu0 %2163, %v2562_v11  }
 0x337   : > { %1073 = vperm.xlu1 %2164, %v2553_v62  }
 0x33b   : > { %1177 = vperm.xlu1 %2164, %v2566_v14  }
 0x33c   : > { %v2569_v16 = vpop.eup %2179 }
 0x33d   : > { %v2571_v18 = vpop.eup %2181  ;;  %1192 = vperm.xlu0 %2163, %v2569_v16  }
 0x33e   : > { %v2575_v19 = vpop.eup %2183 }
 0x33f   : > { %1172 = vperm.xlu1 %2164, %v2571_v18  }
 0x343   : > { %1187 = vperm.xlu1 %2164, %v2575_v19  }
 0x398   : > { %v1049_v20 = vpop.permute.xlu1 %1048 }
 0x399   : > { %v1078_v21 = vsub.f32 %v2499_v4, %v1049_v20  ;;  %v1100_v20 = vld [vmem:[#allocation4] sm:$0xff] }
 0x39a   : > { %v1039_v22 = vpop.permute.xlu0 %1038 }
 0x39b   : > { %v1088_v23 = vmul.f32 1.442695, %v1078_v21  ;;  %v1076_v24 = vsub.f32 %v2503_v6, %v1039_v22  ;;  %v1108_v21 = vmul.f32 %v2559_v5, %v1100_v20 }
 0x39c   : > { %v1054_v25 = vpop.permute.xlu1 %1053 }
 0x39d   : > { %2185 = vpow2.f32 %v1088_v23  ;;  %v1084_v26 = vmul.f32 1.442695, %v1076_v24  ;;  %v1079_v27 = vsub.f32 %v2507_v8, %v1054_v25  ;;  %v1103_v23 = vld [vmem:[#allocation4 + $0x18] sm:$0xff]  ;;  %v1101_v25 = vld [vmem:[#allocation4 + $0x8] sm:$0xff] }
 0x39f   : > { %2187 = vpow2.f32 %v1084_v26  ;;  %v1090_v28 = vmul.f32 1.442695, %v1079_v27  ;;  %v1111_v26 = vmul.f32 %v2562_v11, %v1103_v23 }
 0x3a0   : > { %v1044_v29 = vpop.permute.xlu1 %1043 }
 0x3a1   : > { %2189 = vpow2.f32 %v1090_v28  ;;  %v1077_v30 = vsub.f32 %v2511_v10, %v1044_v29  ;;  %v1109_v29 = vmul.f32 %v2571_v18, %v1101_v25  ;;  %v1107_v18 = vld [vmem:[#allocation4 + $0x38] sm:$0xff] }
 0x3a3   : > { %v1086_v31 = vmul.f32 1.442695, %v1077_v30 }
 0x3a5   : > { %2191 = vpow2.f32 %v1086_v31  ;;  %v1106_v31 = vld [vmem:[#allocation4 + $0x30] sm:$0xff] }
 0x3a6   : > { %v1069_v32 = vpop.permute.xlu1 %1068 }
 0x3a7   : > { %v1082_v4 = vsub.f32 %v2515_v12, %v1069_v32 }
 0x3a9   : > { %v1096_v33 = vmul.f32 1.442695, %v1082_v4  ;;  %v1104_v4 = vld [vmem:[#allocation4 + $0x20] sm:$0xff] }
 0x3aa   : > { %v2186_v34 = vpop.eup %2185  ;;  %v1059_v35 = vpop.permute.xlu1 %1058 }
 0x3ab   : > { %2193 = vpow2.f32 %v1096_v33  ;;  %v1080_v6 = vsub.f32 %v2517_v13, %v1059_v35  ;;  %v1122_v36 = vsel %vm729_vm3, %v2186_v34, 0.0 }
 0x3ac   : > { %v2188_v8 = vpop.eup %2187  ;;  %1123 = vadd.xlane.f32.xlu0 %v1122_v36  ;;  %v1168_v63 = vpop.permute.xlu0 %1167 }
 0x3ad   : > { %v1092_v37 = vmul.f32 1.442695, %v1080_v6  ;;  %v1116_v38 = vsel %vm729_vm3, %v2188_v8, 0.0 }
 0x3ae   : > { %v2190_v39 = vpop.eup %2189  ;;  %1117 = vadd.xlane.f32.xlu1 %v1116_v38  ;;  %v1064_v10 = vpop.permute.xlu1 %1063 }
 0x3af   : > { %2195 = vpow2.f32 %v1092_v37  ;;  %v1081_v40 = vsub.f32 %v2523_v17, %v1064_v10  ;;  %v1125_v41 = vsel %vm729_vm3, %v2190_v39, 0.0  ;;  %v1214_v47 = vpack.c.bf16 %v2190_v39, %v2186_v34 }
 0x3b0   : > { %v1183_v1 = vpop.permute.xlu0 %1182  ;;  %v1112_v34 = vmul.f32 %v2575_v19, %v1104_v4 }
 0x3b1   : > { %v1094_v12 = vmul.f32 1.442695, %v1081_v40  ;;  %v1159_v40 = vld [vmem:[#allocation5 + $0x10] sm:$0xff] }
 0x3b2   : > { %v2192_v43 = vpop.eup %2191  ;;  %1126 = vadd.xlane.f32.xlu1 %v1125_v41  ;;  %v1074_v44 = vpop.permute.xlu1 %1073  ;;  %v1160_v41 = vld [vmem:[#allocation5 + $0x18] sm:$0xff] }
 0x3b3   : > { %2197 = vpow2.f32 %v1094_v12  ;;  %v1083_v13 = vsub.f32 %v2521_v15, %v1074_v44  ;;  %v1119_v45 = vsel %vm729_vm3, %v2192_v43, 0.0  ;;  %v1213_v46 = vpack.c.bf16 %v2192_v43, %v2188_v8  ;;  %v1105_v8 = vld [vmem:[#allocation4 + $0x28] sm:$0xff]  ;;  %v1157_v12 = vld [vmem:[#allocation5] sm:$0xff] }
 0x3b4   : > { %1120 = vadd.xlane.f32.xlu0 %v1119_v45  ;;  %v1113_v38 = vmul.f32 %v2569_v16, %v1105_v8  ;;  %v1205_v44 = vmul.f32 %v1168_v63, %v1157_v12  ;;  %v1158_v45 = vld [vmem:[#allocation5 + $0x8] sm:$0xff] }
 0x3b5   : > { %v1098_v48 = vmul.f32 1.442695, %v1083_v13  ;;  %2055 = vmatprep.mubr.msk.bf16.mxu1 %vm729_vm3, %v1213_v46 }
 0x3b6   : > { %2056 = vmatmul.mubr.msk.bf16.vlgmr.msra.gmra.mxu1 %vm729_vm3, %v1214_v47  ;;  %v1178_v0 = vpop.permute.xlu1 %1177  ;;  %v1208_v47 = vmul.f32 %v1183_v1, %v1160_v41 }
 0x3b7   : > { %2199 = vpow2.f32 %v1098_v48  ;;  %v1207_v19 = vmul.f32 %v1178_v0, %v1159_v40 }
 0x3b8   : > { %v2194_v17 = vpop.eup %2193  ;;  %2201 = vpow2.f32 %v1034_v56  ;;  %v2604_v3 = vpop.permute.xlu0 %1192  ;;  %v1161_v56 = vld [vmem:[#allocation5 + $0x20] sm:$0xff] }
 0x3b9   : > { %v1134_v49 = vsel %vm729_vm3, %v2194_v17, 0.0  ;;  %2203 = vpow2.f32 %v1032_v60 }
 0x3ba   : > { %1135 = vadd.xlane.f32.xlu0 %v1134_v49  ;;  %v1173_v2 = vpop.permute.xlu1 %1172 }
 0x3bb   : > { %v1206_v49 = vmul.f32 %v1173_v2, %v1158_v45 }
 0x3bc   : > { %v2196_v51 = vpop.eup %2195 }
 0x3bd   : > { %v1128_v52 = vsel %vm729_vm3, %v2196_v51, 0.0 }
 0x3be   : > { %1129 = vadd.xlane.f32.xlu0 %v1128_v52  ;;  %v2606_v9 = vpop.permute.xlu1 %1187 }
 0x3c0   : > { %v2198_v15 = vpop.eup %2197 }
 0x3c1   : > { %v1215_v54 = vpack.c.bf16 %v2198_v15, %v2196_v51  ;;  %v1131_v61 = vsel %vm729_vm3, %v2198_v15, 0.0  ;;  %v1163_v15 = vld [vmem:[#allocation5 + $0x30] sm:$0xff] }
 0x3c3   : > { %2059 = vmatprep.mubr.msk.bf16.mxu1 %vm729_vm3, %v1215_v54 }
 0x3c4   : > { %v2200_v57 = vpop.eup %2199 }
 0x3c5   : > { %v1137_v58 = vsel %vm729_vm3, %v2200_v57, 0.0  ;;  %v1216_v59 = vpack.c.bf16 %v2200_v57, %v2194_v17  ;;  %v2202_v53 = vpop.eup %2201 }
 0x3c6   : > { %1138 = vadd.xlane.f32.xlu1 %v1137_v58  ;;  %v2204_v62 = vpop.eup %2203  ;;  %v1115_v6 = vmul.f32 %v2202_v53, %v1107_v18  ;;  %v1164_v58 = vld [vmem:[#allocation5 + $0x38] sm:$0xff] }
 0x3c7   : > { %2060 = vmatmul.mubr.msk.bf16.gmra.mxu1 %vm729_vm3, %v1216_v59  ;;  %v1114_v5 = vmul.f32 %v2204_v62, %v1106_v31 }
 0x3ca   : > { %1132 = vadd.xlane.f32.xlu1 %v1131_v61  ;;  %v1209_v61 = vmul.f32 %v2606_v9, %v1161_v56 }
 0x3d4   : > { %1202 = vperm.xlu0 %2163, %v2202_v53  }
 0x3db   : > { %1197 = vperm.xlu1 %2164, %v2204_v62   ;;  %v1162_v62 = vld [vmem:[#allocation5 + $0x28] sm:$0xff] }
 0x3dc   : > { %v1210_v7 = vmul.f32 %v2604_v3, %v1162_v62 }
 0x435   : > { %v1124_v50 = vpop.xlane.xlu0 %1123 }
 0x436   : > { %v1142_v55 = vadd.f32 %v1124_v50, %v1110_v42 }
 0x437   : > { %v1118_v22 = vpop.xlane.xlu1 %1117 }
 0x438   : > { %1151 = vst.msk [vmem:[#allocation4 + $0x10] sm:$0xff] %vm1148_vm4, %v1142_v55  ;;  %v1140_v24 = vadd.f32 %v1118_v22, %v1108_v21 }
 0x43a   : > { %1149 = vst.msk [vmem:[#allocation4] sm:$0xff] %vm1148_vm4, %v1140_v24 }
 0x43b   : > { %v1127_v27 = vpop.xlane.xlu1 %1126 }
 0x43c   : > { %v1143_v28 = vadd.f32 %v1127_v27, %v1111_v26 }
 0x43d   : > { %v1121_v30 = vpop.xlane.xlu0 %1120 }
 0x43e   : > { %1152 = vst.msk [vmem:[#allocation4 + $0x18] sm:$0xff] %vm1148_vm4, %v1143_v28  ;;  %v1141_v14 = vadd.f32 %v1121_v30, %v1109_v29 }
 0x440   : > { %1150 = vst.msk [vmem:[#allocation4 + $0x8] sm:$0xff] %vm1148_vm4, %v1141_v14 }
 0x443   : > { %v1136_v32 = vpop.xlane.xlu0 %1135 }
 0x444   : > { %v1146_v33 = vadd.f32 %v1136_v32, %v1114_v5 }
 0x446   : > { %1155 = vst.msk [vmem:[#allocation4 + $0x30] sm:$0xff] %vm1148_vm4, %v1146_v33 }
 0x447   : > { %v1130_v11 = vpop.xlane.xlu0 %1129 }
 0x448   : > { %v1144_v35 = vadd.f32 %v1130_v11, %v1112_v34 }
 0x44a   : > { %1153 = vst.msk [vmem:[#allocation4 + $0x20] sm:$0xff] %vm1148_vm4, %v1144_v35 }
 0x44f   : > { %v1139_v36 = vpop.xlane.xlu1 %1138  ;;  %v1203_v59 = vpop.permute.xlu0 %1202 }
 0x450   : > { %v1147_v37 = vadd.f32 %v1139_v36, %v1115_v6  ;;  %v1212_v0 = vmul.f32 %v1203_v59, %v1164_v58 }
 0x452   : > { %1156 = vst.msk [vmem:[#allocation4 + $0x38] sm:$0xff] %vm1148_vm4, %v1147_v37 }
 0x453   : > { %v1133_v39 = vpop.xlane.xlu1 %1132 }
 0x454   : > { %v1145_v10 = vadd.f32 %v1133_v39, %v1113_v38 }
 0x456   : > { %1154 = vst.msk [vmem:[#allocation4 + $0x28] sm:$0xff] %vm1148_vm4, %v1145_v10 }
 0x457   : > { %v1198_v54 = vpop.permute.xlu1 %1197 }
 0x458   : > { %v1211_v57 = vmul.f32 %v1198_v54, %v1163_v15 }
 0x476   : > { %v2057_v43 = vpop.f32.mrf.mxu1 }
 0x477   : > { %v1296_v13 = vadd.f32 %v2057_v43, %v1207_v19 }
 0x478   : > { %v1263_v46 = vpop.f32.mrf.mxu1 }
 0x479   : > { %1304 = vst.msk [vmem:[#allocation5 + $0x10] sm:$0xff] %vm729_vm3, %v1296_v13  ;;  %v1294_v48 = vadd.f32 %v1263_v46, %v1205_v44 }
 0x47a   : > { %v2058_v17 = vpop.f32.mrf.mxu1 }
 0x47b   : > { %1302 = vst.msk [vmem:[#allocation5] sm:$0xff] %vm729_vm3, %v1294_v48  ;;  %v1297_v16 = vadd.f32 %v2058_v17, %v1208_v47 }
 0x47c   : > { %v1266_v51 = vpop.f32.mrf.mxu1 }
 0x47d   : > { %1305 = vst.msk [vmem:[#allocation5 + $0x18] sm:$0xff] %vm729_vm3, %v1297_v16  ;;  %v1295_v52 = vadd.f32 %v1266_v51, %v1206_v49 }
 0x47f   : > { %1303 = vst.msk [vmem:[#allocation5 + $0x8] sm:$0xff] %vm729_vm3, %v1295_v52 }
 0x487   : > { %v2061_v60 = vpop.f32.mrf.mxu1 }
 0x488   : > { %v1300_v53 = vadd.f32 %v2061_v60, %v1211_v57 }
 0x489   : > { %v1279_v63 = vpop.f32.mrf.mxu1 }
 0x48a   : > { %1308 = vst.msk [vmem:[#allocation5 + $0x30] sm:$0xff] %vm729_vm3, %v1300_v53  ;;  %v1298_v1 = vadd.f32 %v1279_v63, %v1209_v61 }
 0x48b   : > { %v2062_v2 = vpop.f32.mrf.mxu1 }
 0x48c   : > { %1306 = vst.msk [vmem:[#allocation5 + $0x20] sm:$0xff] %vm729_vm3, %v1298_v1  ;;  %v1301_v20 = vadd.f32 %v2062_v2, %v1212_v0  ;;  %1321 = sbr.rel (%p1929_p8) target bundleno = 1960 (0x7a8), region = 84 }
 0x48d   : > { %v1282_v42 = vpop.f32.mrf.mxu1 }
 0x48e   : > { %1309 = vst.msk [vmem:[#allocation5 + $0x38] sm:$0xff] %vm729_vm3, %v1301_v20  ;;  %v1299_v50 = vadd.f32 %v1282_v42, %v1210_v7 }
 0x490   : > { %1307 = vst.msk [vmem:[#allocation5 + $0x28] sm:$0xff] %vm729_vm3, %v1299_v50 }
 0x491   : > { %v1332_v9 = vld [vmem:[#allocation4 + $0x10] sm:$0xff]  ;;  %v1330_v55 = vld [vmem:[#allocation4] sm:$0xff]  ;;  %v1333_v21 = vld [vmem:[#allocation4 + $0x18] sm:$0xff]  ;;  %v2290_v22 = vmov 0   ;;  %vm1701_vm5 = vcmask 523264  }
 0x492   : > { %2206 = vset.pattern.permute.xlu1 %v2290_v22  ;;  %2205 = vset.pattern.permute.xlu0 %v2290_v22  ;;  %2215 = vrcp.f32 %v1332_v9  ;;  %v1331_v3 = vld [vmem:[#allocation4 + $0x8] sm:$0xff]  ;;  %v1334_v24 = vld [vmem:[#allocation4 + $0x20] sm:$0xff]  ;;  %v1337_v25 = vld [vmem:[#allocation4 + $0x38] sm:$0xff] }
 0x493   : > { %2217 = vrcp.f32 %v1330_v55  ;;  %v1335_v23 = vld [vmem:[#allocation4 + $0x28] sm:$0xff]  ;;  %v1336_v26 = vld [vmem:[#allocation4 + $0x30] sm:$0xff]  ;;  %v2208_v30 = vld [vmem:[%s2757_s8] sm:$0xff]  }
 0x494   : > { %2219 = vrcp.f32 %v1333_v21  ;;  %v2207_v27 = vld [vmem:[%s2757_s8 + $0x8] sm:$0xff]   ;;  %v1324_v35 = vld [vmem:[#allocation5 + $0x10] sm:$0xff]  ;;  %v1325_v18 = vld [vmem:[#allocation5 + $0x18] sm:$0xff] }
 0x495   : > { %2221 = vrcp.f32 %v1331_v3  ;;  %2063 = vmatprep.subr.bf16.mxu0 %v2207_v27  ;;  %v1322_v6 = vld [vmem:[#allocation5] sm:$0xff]  ;;  %v1323_v36 = vld [vmem:[#allocation5 + $0x8] sm:$0xff]  ;;  %v1329_v47 = vld [vmem:[#allocation5 + $0x38] sm:$0xff] }
 0x496   : > { %2223 = vrcp.f32 %v1335_v23  ;;  %2064 = vmatpush3.bf16.msra.mxu0 %v2207_v27  ;;  %v1326_v41 = vld [vmem:[#allocation5 + $0x20] sm:$0xff]  ;;  %v1328_v48 = vld [vmem:[#allocation5 + $0x30] sm:$0xff]  ;;  %v2209_v54 = vld [vmem:[%s2759_s10 + $0x8] sm:$0xff]  }
 0x497   : > { %2225 = vrcp.f32 %v1334_v24  ;;  %2065 = vmatprep.subr.bf16.mxu0 %v2208_v30  ;;  %v1327_v12 = vld [vmem:[#allocation5 + $0x28] sm:$0xff]  ;;  %2075 = vmatprep.subr.bf16.mxu1 %v2209_v54  ;;  %v2210_v56 = vld [vmem:[%s2759_s10] sm:$0xff]   ;;  %v1501_v62 = vld [vmem:[%s2402_s25 + $0x18] sm:$0xff] }
 0x498   : > { %2227 = vrcp.f32 %v1337_v25  ;;  %2076 = vmatpush3.bf16.msra.mxu1 %v2209_v54  ;;  %v1930_v59 = vld [vmem:[%s2758_s9] ss:$0 sm:$0xff]  ;;  %v1499_v2 = vld [vmem:[%s2402_s25 + $0x8] sm:$0xff]  ;;  %v1500_v7 = vld [vmem:[%s2402_s25 + $0x10] sm:$0xff] }
 0x499   : > { %2229 = vrcp.f32 %v1336_v26  ;;  %2077 = vmatprep.subr.bf16.mxu1 %v2210_v56  ;;  %v1498_v1 = vld [vmem:[%s2402_s25] sm:$0xff]  ;;  %v1505_v27 = vld [vmem:[%s2402_s25 + $0x38] sm:$0xff] }
 0x49a   : > { %2066 = vmatpush3.bf16.msra.mxu0 %v2208_v30 }
 0x49c   : > { %2078 = vmatpush3.bf16.msra.mxu1 %v2210_v56 }
 0x49f   : > { %v2216_v28 = vpop.eup %2215 }
 0x4a0   : > { %v2218_v29 = vpop.eup %2217  ;;  %1358 = vperm.xlu1 %2206, %v2216_v28  }
 0x4a1   : > { %v2220_v14 = vpop.eup %2219  ;;  %1348 = vperm.xlu0 %2205, %v2218_v29   ;;  %v1502_v29 = vld [vmem:[%s2402_s25 + $0x20] sm:$0xff] }
 0x4a2   : > { %v2222_v31 = vpop.eup %2221 }
 0x4a3   : > { %v2224_v5 = vpop.eup %2223 }
 0x4a4   : > { %1363 = vperm.xlu1 %2206, %v2220_v14   ;;  %v2226_v32 = vpop.eup %2225  ;;  %v1503_v14 = vld [vmem:[%s2402_s25 + $0x28] sm:$0xff] }
 0x4a5   : > { %1353 = vperm.xlu0 %2205, %v2222_v31   ;;  %v2228_v4 = vpop.eup %2227  ;;  %v1504_v31 = vld [vmem:[%s2402_s25 + $0x30] sm:$0xff] }
 0x4a6   : > { %v2230_v33 = vpop.eup %2229 }
 0x4a8   : > { %1373 = vperm.xlu1 %2206, %v2224_v5  }
 0x4a9   : > { %1368 = vperm.xlu0 %2205, %v2226_v32  }
 0x4ac   : > { %1383 = vperm.xlu1 %2206, %v2228_v4  }
 0x4ad   : > { %1378 = vperm.xlu0 %2205, %v2230_v33  }
 0x51b   : > { %v1359_v34 = vpop.permute.xlu1 %1358 }
 0x51c   : > { %v1349_v11 = vpop.permute.xlu0 %1348  ;;  %v1388_v37 = vmul.f32 %v1359_v34, %v1324_v35 }
 0x51d   : > { %v1386_v10 = vmul.f32 %v1349_v11, %v1322_v6  ;;  %v2212_v6 = vld [vmem:[%s2761_s12 + $0x10] sm:$0xff]  }
 0x51f   : > { %v1364_v8 = vpop.permute.xlu1 %1363 }
 0x520   : > { %v1389_v38 = vmul.f32 %v1364_v8, %v1325_v18  ;;  %v1354_v39 = vpop.permute.xlu0 %1353  ;;  %v2211_v18 = vld [vmem:[%s2761_s12 + $0x18] sm:$0xff]   ;;  %v2214_v8 = vld [vmem:[%s2761_s12] sm:$0xff]  }
 0x521   : > { %v1387_v40 = vmul.f32 %v1354_v39, %v1323_v36  ;;  %2087 = vmatprep.subr.bf16.mxu0 %v2211_v18  ;;  %2107 = vmatprep.subr.bf16.mxu1 %v2211_v18  ;;  %v2213_v36 = vld [vmem:[%s2761_s12 + $0x8] sm:$0xff]  }
 0x522   : > { %v1395_v19 = vpack.c.bf16 %v1389_v38, %v1388_v37  ;;  %v1937_v37 = vld [vmem:[%s2760_s11] ss:$0 sm:$0xff] }
 0x523   : > { %v1374_v43 = vpop.permute.xlu1 %1373  ;;  %v1394_v44 = vpack.c.bf16 %v1387_v40, %v1386_v10 }
 0x524   : > { %v1391_v13 = vmul.f32 %v1374_v43, %v1327_v12  ;;  %v1369_v45 = vpop.permute.xlu0 %1368 }
 0x525   : > { %v1390_v46 = vmul.f32 %v1369_v45, %v1326_v41  ;;  %2067 = vmatprep.mubr.msk.bf16.mxu0 %vm729_vm3, %v1394_v44 }
 0x526   : > { %2068 = vmatmul.mubr.msk.bf16.vlgmr.msra.gmra.mxu0 %vm729_vm3, %v1395_v19 }
 0x527   : > { %v1396_v17 = vpack.c.bf16 %v1391_v13, %v1390_v46  ;;  %v1384_v49 = vpop.permute.xlu1 %1383  ;;  %2088 = vmatpush3.bf16.msra.mxu0 %v2211_v18 }
 0x528   : > { %v1393_v16 = vmul.f32 %v1384_v49, %v1329_v47  ;;  %v1379_v51 = vpop.permute.xlu0 %1378  ;;  %2089 = vmatprep.subr.bf16.mxu0 %v2212_v6 }
 0x529   : > { %v1392_v52 = vmul.f32 %v1379_v51, %v1328_v48  ;;  %2071 = vmatprep.mubr.msk.bf16.mxu0 %vm729_vm3, %v1396_v17 }
 0x52b   : > { %v1397_v15 = vpack.c.bf16 %v1393_v16, %v1392_v52  ;;  %2090 = vmatpush3.bf16.msra.mxu0 %v2212_v6 }
 0x52c   : > { %2091 = vmatprep.subr.bf16.mxu0 %v2213_v36 }
 0x52e   : > { %2072 = vmatmul.mubr.msk.bf16.gmra.mxu0 %vm729_vm3, %v1397_v15 }
 0x52f   : > { %2092 = vmatpush3.bf16.msra.mxu0 %v2213_v36 }
 0x530   : > { %2093 = vmatprep.subr.bf16.mxu0 %v2214_v8 }
 0x533   : > { %2094 = vmatpush3.bf16.msra.mxu0 %v2214_v8 }
 0x5e6   : > { %v2069_v57 = vpop.f32.mrf.mxu0 }
 0x5e7   : > { %v1476_v63 = vadd.f32 %v2069_v57, %v1930_v59 }
 0x5e8   : > { %v1467_v58 = vpop.f32.mrf.mxu0 }
 0x5e9   : > { %v1468_v61 = vadd.f32 %v1930_v59, %v1467_v58  ;;  %v2662_v21 = vadd.f32 %v1500_v7, %v1476_v63 }
 0x5ea   : > { %v2070_v60 = vpop.f32.mrf.mxu0 }
 0x5eb   : > { %v1479_v53 = vadd.f32 %v2070_v60, %v1930_v59  ;;  %v2658_v9 = vadd.f32 %v1498_v1, %v1468_v61 }
 0x5ec   : > { %v1470_v0 = vpop.f32.mrf.mxu0 }
 0x5ed   : > { %v1471_v20 = vadd.f32 %v1930_v59, %v1470_v0  ;;  %v2656_v42 = vadd.f32 %v1501_v62, %v1479_v53 }
 0x5ee   : > { %v2073_v50 = vpop.f32.mrf.mxu0 }
 0x5ef   : > { %v2660_v55 = vadd.f32 %v1499_v2, %v1471_v20  ;;  %v1515_v24 = vpack.c.bf16 %v2656_v42, %v2662_v21  ;;  %v1492_v28 = vadd.f32 %v2073_v50, %v1930_v59 }
 0x5f0   : > { %v1483_v22 = vpop.f32.mrf.mxu0 }
 0x5f1   : > { %v1514_v3 = vpack.c.bf16 %v2660_v55, %v2658_v9  ;;  %v1484_v25 = vadd.f32 %v1930_v59, %v1483_v22  ;;  %v2680_v34 = vadd.f32 %v1504_v31, %v1492_v28 }
 0x5f2   : > { %v2074_v23 = vpop.f32.mrf.mxu0 }
 0x5f3   : > { %v1495_v26 = vadd.f32 %v2074_v23, %v1930_v59  ;;  %2079 = vmatprep.mubr.msk.bf16.mxu1 %vm729_vm3, %v1514_v3  ;;  %v2676_v4 = vadd.f32 %v1502_v29, %v1484_v25 }
 0x5f4   : > { %v1486_v30 = vpop.f32.mrf.mxu0  ;;  %2080 = vmatmul.mubr.msk.bf16.vlgmr.msra.gmra.mxu1 %vm729_vm3, %v1515_v24 }
 0x5f5   : > { %v1487_v5 = vadd.f32 %v1930_v59, %v1486_v30  ;;  %v2674_v32 = vadd.f32 %v1505_v27, %v1495_v26  ;;  %2111 = vmatpush3.bf16.msra.mxu1 %v2211_v18 }
 0x5f6   : > { %2108 = vmatprep.subr.bf16.mxu1 %v2212_v6 }
 0x5f7   : > { %v2678_v33 = vadd.f32 %v1503_v14, %v1487_v5  ;;  %v1517_v35 = vpack.c.bf16 %v2674_v32, %v2680_v34 }
 0x5f9   : > { %v1516_v11 = vpack.c.bf16 %v2678_v33, %v2676_v4  ;;  %2112 = vmatpush3.bf16.msra.mxu1 %v2212_v6 }
 0x5fa   : > { %2109 = vmatprep.subr.bf16.mxu1 %v2213_v36 }
 0x5fb   : > { %2083 = vmatprep.mubr.msk.bf16.mxu1 %vm729_vm3, %v1516_v11 }
 0x5fc   : > { %2084 = vmatmul.mubr.msk.bf16.gmra.mxu1 %vm729_vm3, %v1517_v35 }
 0x5fd   : > { %2113 = vmatpush3.bf16.msra.mxu1 %v2213_v36 }
 0x5fe   : > { %2110 = vmatprep.subr.bf16.mxu1 %v2214_v8 }
 0x601   : > { %2114 = vmatpush3.bf16.msra.mxu1 %v2214_v8 }
 0x6b4   : > { %v2081_v38 = vpop.f32.mrf.mxu1 }
 0x6b5   : > { %v1596_v39 = vadd.f32 %v2081_v38, %v1937_v37 }
 0x6b6   : > { %v1587_v10 = vpop.f32.mrf.mxu1 }
 0x6b7   : > { %v1588_v40 = vadd.f32 %v1937_v37, %v1587_v10  ;;  %v1628_v12 = vmul.f32 0.70710677, %v1596_v39  ;;  %v1620_v50 = vmul.f32 0.5, %v1596_v39 }
 0x6b8   : > { %v2082_v19 = vpop.f32.mrf.mxu1 }
 0x6b9   : > { %v1626_v41 = vmul.f32 0.70710677, %v1588_v40  ;;  %v1599_v43 = vadd.f32 %v2082_v19, %v1937_v37  ;;  %v1618_v2 = vmul.f32 0.5, %v1588_v40 }
 0x6ba   : > { %v1590_v44 = vpop.f32.mrf.mxu1 }
 0x6bb   : > { %2231 = verf.f32 %v1626_v41  ;;  %v1629_v13 = vmul.f32 0.70710677, %v1599_v43  ;;  %v1591_v45 = vadd.f32 %v1937_v37, %v1590_v44  ;;  %v1621_v1 = vmul.f32 0.5, %v1599_v43 }
 0x6bc   : > { %2233 = verf.f32 %v1628_v12  ;;  %v2085_v46 = vpop.f32.mrf.mxu1  ;;  %v1944_v12 = vld [vmem:[%s2773_s23] ss:$0 sm:$0xff] }
 0x6bd   : > { %2235 = verf.f32 %v1629_v13  ;;  %v1627_v47 = vmul.f32 0.70710677, %v1591_v45  ;;  %v1612_v48 = vadd.f32 %v2085_v46, %v1937_v37  ;;  %v1619_v7 = vmul.f32 0.5, %v1591_v45 }
 0x6be   : > { %v1603_v17 = vpop.f32.mrf.mxu1 }
 0x6bf   : > { %2237 = verf.f32 %v1627_v47  ;;  %v1604_v49 = vadd.f32 %v1937_v37, %v1603_v17  ;;  %v1632_v16 = vmul.f32 0.70710677, %v1612_v48  ;;  %v1624_v36 = vmul.f32 0.5, %v1612_v48 }
 0x6c0   : > { %v2086_v51 = vpop.f32.mrf.mxu1 }
 0x6c1   : > { %v1630_v52 = vmul.f32 0.70710677, %v1604_v49  ;;  %v1615_v15 = vadd.f32 %v2086_v51, %v1937_v37  ;;  %v1622_v35 = vmul.f32 0.5, %v1604_v49 }
 0x6c2   : > { %v1606_v54 = vpop.f32.mrf.mxu1 }
 0x6c3   : > { %2239 = verf.f32 %v1630_v52  ;;  %v1633_v56 = vmul.f32 0.70710677, %v1615_v15  ;;  %v1607_v57 = vadd.f32 %v1937_v37, %v1606_v54  ;;  %v1625_v11 = vmul.f32 0.5, %v1615_v15 }
 0x6c4   : > { %2241 = verf.f32 %v1632_v16 }
 0x6c5   : > { %2243 = verf.f32 %v1633_v56  ;;  %v1631_v58 = vmul.f32 0.70710677, %v1607_v57  ;;  %v1623_v18 = vmul.f32 0.5, %v1607_v57 }
 0x6c7   : > { %2245 = verf.f32 %v1631_v58 }
 0x6c8   : > { %v2232_v59 = vpop.eup %2231 }
 0x6c9   : > { %v2234_v60 = vpop.eup %2233  ;;  %v1642_v53 = vadd.f32 1.0, %v2232_v59 }
 0x6ca   : > { %v2236_v61 = vpop.eup %2235  ;;  %v1644_v0 = vadd.f32 1.0, %v2234_v60 }
 0x6cb   : > { %v1645_v62 = vadd.f32 1.0, %v2236_v61  ;;  %v1650_v3 = vmul.f32 %v1642_v53, %v1618_v2 }
 0x6cc   : > { %v2238_v63 = vpop.eup %2237  ;;  %v1652_v25 = vmul.f32 %v1644_v0, %v1620_v50 }
 0x6cd   : > { %v1643_v20 = vadd.f32 1.0, %v2238_v63  ;;  %v1653_v22 = vmul.f32 %v1645_v62, %v1621_v1 }
 0x6cf   : > { %v1651_v23 = vmul.f32 %v1643_v20, %v1619_v7  ;;  %v1659_v29 = vpack.c.bf16 %v1653_v22, %v1652_v25 }
 0x6d0   : > { %v2240_v24 = vpop.eup %2239 }
 0x6d1   : > { %v2242_v26 = vpop.eup %2241  ;;  %v1658_v27 = vpack.c.bf16 %v1651_v23, %v1650_v3  ;;  %v1646_v30 = vadd.f32 1.0, %v2240_v24 }
 0x6d2   : > { %v2244_v28 = vpop.eup %2243  ;;  %v1648_v5 = vadd.f32 1.0, %v2242_v26 }
 0x6d3   : > { %v1649_v14 = vadd.f32 1.0, %v2244_v28  ;;  %2095 = vmatprep.mubr.msk.bf16.mxu0 %vm1701_vm5, %v1658_v27  ;;  %v1654_v37 = vmul.f32 %v1646_v30, %v1622_v35 }
 0x6d4   : > { %v2246_v31 = vpop.eup %2245  ;;  %2096 = vmatmul.mubr.msk.bf16.vlgmr.msra.gmra.mxu0 %vm1701_vm5, %v1659_v29  ;;  %v1656_v39 = vmul.f32 %v1648_v5, %v1624_v36 }
 0x6d5   : > { %v1647_v6 = vadd.f32 1.0, %v2246_v31  ;;  %v1657_v8 = vmul.f32 %v1649_v14, %v1625_v11 }
 0x6d7   : > { %v1655_v38 = vmul.f32 %v1647_v6, %v1623_v18  ;;  %v1661_v40 = vpack.c.bf16 %v1657_v8, %v1656_v39 }
 0x6d9   : > { %v1660_v10 = vpack.c.bf16 %v1655_v38, %v1654_v37 }
 0x6db   : > { %2099 = vmatprep.mubr.msk.bf16.mxu1 %vm1701_vm5, %v1660_v10 }
 0x6dc   : > { %2100 = vmatmul.mubr.msk.bf16.vlgmr.msra.gmra.mxu1 %vm1701_vm5, %v1661_v40 }
 0x794   : > { %v2097_v19 = vpop.f32.mrf.mxu0 }
 0x795   : > { %v1757_v41 = vadd.f32 %v2097_v19, %v1944_v12 }
 0x796   : > { %v1748_v43 = vpop.f32.mrf.mxu0 }
 0x797   : > { %v1781_v44 = vadd.f32 %v1757_v41, %v2662_v21  ;;  %v1749_v13 = vadd.f32 %v1944_v12, %v1748_v43 }
 0x798   : > { %v2098_v45 = vpop.f32.mrf.mxu0 }
 0x799   : > { %1789 = vst.msk [vmem:[%s2407_s19 + $0x10] sm:$0xff] %vm729_vm3, %v1781_v44  ;;  %v1779_v46 = vadd.f32 %v1749_v13, %v2658_v9  ;;  %v1760_v47 = vadd.f32 %v2098_v45, %v1944_v12 }
 0x79a   : > { %v1751_v48 = vpop.f32.mrf.mxu0 }
 0x79b   : > { %1787 = vst.msk [vmem:[%s2407_s19] sm:$0xff] %vm729_vm3, %v1779_v46  ;;  %v1782_v17 = vadd.f32 %v1760_v47, %v2656_v42  ;;  %v1752_v49 = vadd.f32 %v1944_v12, %v1751_v48 }
 0x79c   : > { %v2101_v16 = vpop.f32.mrf.mxu1 }
 0x79d   : > { %1790 = vst.msk [vmem:[%s2407_s19 + $0x18] sm:$0xff] %vm729_vm3, %v1782_v17  ;;  %v1780_v21 = vadd.f32 %v1752_v49, %v2660_v55  ;;  %v1773_v51 = vadd.f32 %v2101_v16, %v1944_v12 }
 0x79e   : > { %v1764_v52 = vpop.f32.mrf.mxu1 }
 0x79f   : > { %1788 = vst.msk [vmem:[%s2407_s19 + $0x8] sm:$0xff] %vm729_vm3, %v1780_v21  ;;  %v1785_v9 = vadd.f32 %v1773_v51, %v2680_v34  ;;  %v1765_v15 = vadd.f32 %v1944_v12, %v1764_v52 }
 0x7a0   : > { %v2102_v54 = vpop.f32.mrf.mxu1 }
 0x7a1   : > { %1793 = vst.msk [vmem:[%s2407_s19 + $0x30] sm:$0xff] %vm729_vm3, %v1785_v9  ;;  %v1783_v42 = vadd.f32 %v1765_v15, %v2676_v4  ;;  %v1776_v56 = vadd.f32 %v2102_v54, %v1944_v12 }
 0x7a2   : > { %v1767_v57 = vpop.f32.mrf.mxu1 }
 0x7a3   : > { %1791 = vst.msk [vmem:[%s2407_s19 + $0x20] sm:$0xff] %vm729_vm3, %v1783_v42  ;;  %v1786_v58 = vadd.f32 %v1776_v56, %v2674_v32  ;;  %v1768_v55 = vadd.f32 %v1944_v12, %v1767_v57 }
 0x7a5   : > { %1794 = vst.msk [vmem:[%s2407_s19 + $0x38] sm:$0xff] %vm729_vm3, %v1786_v58  ;;  %v1784_v59 = vadd.f32 %v1768_v55, %v2678_v33 }
 0x7a7   : > { %1792 = vst.msk [vmem:[%s2407_s19 + $0x28] sm:$0xff] %vm729_vm3, %v1784_v59 }
 0x7a8 PF: > { %s2774_s24 = sld [smem:[#allocation8_spill]] }
 0x7a9   : > { %s2775_s29 = sld [smem:[#allocation6_spill]] }
 0x7aa   : > { %s2776_s30 = sld [smem:[#allocation7_spill]] }
 0x7ab   : > { %s2777_s15 = sld [smem:[#allocation9_spill]] }
 0x7ac   : > { %s2778_s16 = sld [smem:[#allocation10_spill]] }
 0x7ae   : > { %s24_s17 = sadd.s32 1, %s2774_s24  }
 0x7af   : > { %p21_p9 = scmp.ge.s32.totalorder %s24_s17, 6  }
 0x7b1   :  { %23 = sbr.rel (!%p21_p9) target bundleno = 3 (0x3), region = 117 }

</bundles_post_ra>
